<compile_context>
chip_gen: v7x
topology: tpu7x:2x2x1
jax: 0.10.0
libtpu: 0.0.40
codegen_flags: <defaults>
</compile_context>

<pallas_src>
import math
from functools import partial

import jax
import jax.numpy as jnp
from jax import lax
from jax.experimental import pallas as pl
from jax.experimental.pallas import tpu as pltpu

# Explicit scoped-VMEM cap; safe default on v5e/v6e (128 MiB phys) and v7x (64 MiB phys).
# Raise (esp. on v5e) if S_pad * d_llm grows large enough that the resident V' needs it.
_VMEM_LIMIT = 32 * 1024 * 1024
_NEG_INF = -1.0e30


def _round_up(x, m):
    return ((x + m - 1) // m) * m


# ---------------------------------------------------------------------------
# Kernel A: per-head K^T layout + Wo-folded V'  (run once per call, grid=(H,))
# ---------------------------------------------------------------------------

def _prep_kernel(src_ref, val_ref, wkT_ref, bk_ref, wv_ref, bv_ref, wo_ref,
                 kt_ref, vp_ref):
    """One head per grid step.

    src_ref/val_ref : (S_pad, d_llm)   (resident: constant index map)
    wkT_ref : (1, E, d_llm)   bk_ref : (1, E, 1)
    wv_ref  : (1, d_llm, E)   bv_ref : (1, 1, E)
    wo_ref  : (1, E, d_llm)
    kt_ref  : (1, E, S_pad)   vp_ref : (1, S_pad, d_llm)
    """
    # K_h^T : contract Wk_h^T (E, d_llm) with source (S_pad, d_llm) over d_llm -> (E, S_pad).
    # (This is the plain "q @ k^T"-style dot_general; no in-kernel transpose needed.)
    kt = lax.dot_general(wkT_ref[0], src_ref[...], (((1,), (1,)), ((), ())),
                         preferred_element_type=jnp.float32) + bk_ref[0]
    kt_ref[0] = kt.astype(kt_ref.dtype)

    # V'_h = (value @ Wv_h + bv_h) @ Wo_h   -> (S_pad, d_llm)
    v_h = jnp.dot(val_ref[...], wv_ref[0], preferred_element_type=jnp.float32) + bv_ref[0]
    vp_ref[0] = jnp.dot(v_h, wo_ref[0],
                        preferred_element_type=jnp.float32).astype(vp_ref.dtype)


def _prep_kv(source, value, wk, bk, wv, bv, wo, *, n_heads, s_pad, kv_dtype):
    S, d_llm = source.shape
    he = wk.shape[1]
    e = he // n_heads

    # Zero-pad prototypes to a lane-dense S; padded columns are masked out of the softmax
    # later via the score bias, and p==0 there kills the (finite) padded V' rows.
    if s_pad != S:
        source = jnp.pad(source, ((0, s_pad - S), (0, 0)))
        value = jnp.pad(value, ((0, s_pad - S), (0, 0)))

    # Per-head weight layouts (leading head axis -> leading-axis slices only in-kernel).
    wkT = wk.reshape(d_llm, n_heads, e).transpose(1, 2, 0)     # (H, E, d_llm)
    bk3 = bk.reshape(n_heads, e, 1)                            # (H, E, 1)
    wv3 = wv.reshape(d_llm, n_heads, e).transpose(1, 0, 2)     # (H, d_llm, E)
    bv3 = bv.reshape(n_heads, 1, e)                            # (H, 1, E)
    wo3 = wo.reshape(n_heads, e, d_llm)                        # (H, E, d_llm)

    return pl.pallas_call(
        _prep_kernel,
        out_shape=(jax.ShapeDtypeStruct((n_heads, e, s_pad), kv_dtype),
                   jax.ShapeDtypeStruct((n_heads, s_pad, d_llm), kv_dtype)),
        grid=(n_heads,),
        in_specs=[
            pl.BlockSpec((s_pad, d_llm), lambda h: (0, 0)),      # source (resident)
            pl.BlockSpec((s_pad, d_llm), lambda h: (0, 0)),      # value  (resident)
            pl.BlockSpec((1, e, d_llm), lambda h: (h, 0, 0)),    # Wk^T per head
            pl.BlockSpec((1, e, 1), lambda h: (h, 0, 0)),        # bk per head
            pl.BlockSpec((1, d_llm, e), lambda h: (h, 0, 0)),    # Wv per head
            pl.BlockSpec((1, 1, e), lambda h: (h, 0, 0)),        # bv per head
            pl.BlockSpec((1, e, d_llm), lambda h: (h, 0, 0)),    # Wo per head
        ],
        out_specs=(pl.BlockSpec((1, e, s_pad), lambda h: (h, 0, 0)),
                   pl.BlockSpec((1, s_pad, d_llm), lambda h: (h, 0, 0))),
        compiler_params=pltpu.CompilerParams(
            dimension_semantics=("parallel",),
            vmem_limit_bytes=_VMEM_LIMIT),
    )(source, value, wkT, bk3, wv3, bv3, wo3)


# ---------------------------------------------------------------------------
# Kernel B: fused Q projection + attention + (folded) output projection,
#           grid over (B*L) row tiles.
# ---------------------------------------------------------------------------

def _attn_kernel(x_ref, kt_ref, vp_ref, wq_ref, bq_ref, sbias_ref, bo_ref,
                 out_ref, acc_ref, *, n_heads, scale):
    """x_ref : (TM, d_model)         kt_ref : (H, E, S_pad)   vp_ref : (H, S_pad, d_llm)
       wq_ref: (H, d_model, E)       bq_ref : (H, 1, E)
       sbias_ref : (1, S_pad) f32    bo_ref : (1, d_llm)
       out_ref   : (TM, d_llm)       acc_ref: (TM, d_llm) f32 VMEM scratch
    """
    x = x_ref[...]                               # input dtype; fed straight to the MXU
    sbias = sbias_ref[...]                       # 0 on real columns, -1e30 on padding
    acc_ref[...] = jnp.zeros_like(acc_ref)

    def head_step(h, carry):
        # Q projection per head (leading-axis weight slice; 1/sqrt(E) folded into Q).
        q_h = (jnp.dot(x, wq_ref[h], preferred_element_type=jnp.float32)
               + bq_ref[h]) * scale                                      # (TM, E) f32
        # Scores: lane-dense (TM, S_pad) output, plain (non-transposed) dot.
        s = jnp.dot(q_h.astype(kt_ref.dtype), kt_ref[h],
                    preferred_element_type=jnp.float32) + sbias
        m = jnp.max(s, axis=-1, keepdims=True)
        p = jnp.exp(s - m)
        p = p * pl.reciprocal(jnp.sum(p, axis=-1, keepdims=True), approx=True)
        # Attention + output projection in one contraction over S (Wo pre-folded into V').
        acc_ref[...] += jnp.dot(p.astype(vp_ref.dtype), vp_ref[h],
                                preferred_element_type=jnp.float32)      # (TM, d_llm)
        return carry

    lax.fori_loop(0, n_heads, head_step, 0, unroll=True)
    out_ref[...] = (acc_ref[...] + bo_ref[...]).astype(out_ref.dtype)    # lane-dense store


def _fused_attention(target, kt, vp, wq, bq, bo, sbias, *, n_heads, row_tile=256):
    B, L, d_model = target.shape
    _, e, s_pad = kt.shape
    d_llm = vp.shape[2]
    scale = 1.0 / math.sqrt(e)

    # Flatten the batch into the matmul M dimension and tile it.
    bl = B * L
    tm = min(row_tile, _round_up(bl, 8))
    bl_pad = _round_up(bl, tm)
    x2d = target.reshape(bl, d_model)
    if bl_pad != bl:
        x2d = jnp.pad(x2d, ((0, bl_pad - bl), (0, 0)))   # padded rows are sliced off below

    wq3 = wq.reshape(d_model, n_heads, e).transpose(1, 0, 2)   # (H, d_model, E)
    bq3 = bq.reshape(n_heads, 1, e)                            # (H, 1, E)
    bo2 = bo.reshape(1, d_llm)

    kernel = partial(_attn_kernel, n_heads=n_heads, scale=scale)
    out2d = pl.pallas_call(
        kernel,
        out_shape=jax.ShapeDtypeStruct((bl_pad, d_llm), target.dtype),
        grid=(bl_pad // tm,),
        in_specs=[
            pl.BlockSpec((tm, d_model), lambda i: (i, 0)),               # row tile of Q input
            pl.BlockSpec((n_heads, e, s_pad), lambda i: (0, 0, 0)),      # K^T (resident)
            pl.BlockSpec((n_heads, s_pad, d_llm), lambda i: (0, 0, 0)),  # V'  (resident)
            pl.BlockSpec((n_heads, d_model, e), lambda i: (0, 0, 0)),    # Wq  (resident)
            pl.BlockSpec((n_heads, 1, e), lambda i: (0, 0, 0)),          # bq  (resident)
            pl.BlockSpec((1, s_pad), lambda i: (0, 0)),                  # score pad mask
            pl.BlockSpec((1, d_llm), lambda i: (0, 0)),                  # bo
        ],
        out_specs=pl.BlockSpec((tm, d_llm), lambda i: (i, 0)),
        scratch_shapes=[pltpu.VMEM((tm, d_llm), jnp.float32)],           # head-loop accumulator
        compiler_params=pltpu.CompilerParams(
            dimension_semantics=("parallel",),                           # row tiles independent
            vmem_limit_bytes=_VMEM_LIMIT),
    )(x2d, kt, vp, wq3, bq3, sbias, bo2)

    return out2d[:bl].reshape(B, L, d_llm)


# ---------------------------------------------------------------------------
# ReprogrammingLayer forward
# ---------------------------------------------------------------------------

def init_params(key, d_model, n_heads, d_llm, d_keys=None, dtype=jnp.float32):
    d_keys = d_keys or d_model // n_heads
    dkh = d_keys * n_heads
    ks = jax.random.split(key, 8)

    def lin(kw, kb, fan_in, fan_out):
        # torch nn.Linear default init: U(-1/sqrt(fan_in), 1/sqrt(fan_in))
        bound = 1.0 / math.sqrt(fan_in)
        w = jax.random.uniform(kw, (fan_in, fan_out), dtype, -bound, bound)
        b = jax.random.uniform(kb, (fan_out,), dtype, -bound, bound)
        return w, b

    wq, bq = lin(ks[0], ks[1], d_model, dkh)
    wk, bk = lin(ks[2], ks[3], d_llm, dkh)
    wv, bv = lin(ks[4], ks[5], d_llm, dkh)
    wo, bo = lin(ks[6], ks[7], dkh, d_llm)
    return dict(wq=wq, bq=bq, wk=wk, bk=bk, wv=wv, bv=bv, wo=wo, bo=bo)


@partial(jax.jit, static_argnames=("n_heads",))
def reprogramming_layer_forward(params, target_embedding, source_embedding,
                                value_embedding, n_heads):
    S, _ = source_embedding.shape
    s_pad = _round_up(S, 128)                      # lane-dense score tiles
    kv_dtype = target_embedding.dtype              # bf16 inputs stay bf16 into the MXU

    # Batch-independent prep (K^T layout + Wo folded into V'), computed once.
    kt, vp = _prep_kv(source_embedding, value_embedding,
                      params["wk"], params["bk"], params["wv"], params["bv"],
                      params["wo"], n_heads=n_heads, s_pad=s_pad, kv_dtype=kv_dtype)

    # Additive score mask for the padded S columns (0 on real columns).
    sbias = jnp.where(jnp.arange(s_pad) < S, 0.0, _NEG_INF).astype(jnp.float32)
    sbias = sbias.reshape(1, s_pad)

    # Fused Q projection + attention + output projection over (B*L) row tiles.
    return _fused_attention(target_embedding, kt, vp,
                            params["wq"], params["bq"], params["bo"], sbias,
                            n_heads=n_heads)


def _reference_forward(params, target, source, value, n_heads):
    """Pure-JAX reference mirroring the PyTorch module (eval mode)."""
    B, L, _ = target.shape
    S, _ = source.shape
    H = n_heads
    E = params["wq"].shape[1] // H
    q = (target @ params["wq"] + params["bq"]).reshape(B, L, H, E)
    k = (source @ params["wk"] + params["bk"]).reshape(S, H, E)
    v = (value @ params["wv"] + params["bv"]).reshape(S, H, E)
    scale = 1.0 / math.sqrt(E)
    scores = jnp.einsum("blhe,she->bhls", q, k)
    A = jax.nn.softmax(scale * scores, axis=-1)
    rep = jnp.einsum("bhls,she->blhe", A, v).reshape(B, L, H * E)
    return rep @ params["wo"] + params["bo"]


# ---------------------------------------------------------------------------
# Main
# ---------------------------------------------------------------------------

if __name__ == "__main__":
    # Small shapes consistent with the module's forward.
    B, L = 2, 8          # batch, target sequence length
    S = 16               # number of source (prototype) embeddings
    d_model = 32
    n_heads = 4          # -> d_keys = d_model // n_heads = 8
    d_llm = 128          # lane-dense output (real Time-LLM d_llm = 768/4096 also is)

    key = jax.random.PRNGKey(0)
    k_params, k_tgt, k_src, k_val = jax.random.split(key, 4)

    params = init_params(k_params, d_model, n_heads, d_llm)
    target = jax.random.normal(k_tgt, (B, L, d_model), jnp.float32)
    source = jax.random.normal(k_src, (S, d_llm), jnp.float32)
    value = jax.random.normal(k_val, (S, d_llm), jnp.float32)

    out = reprogramming_layer_forward(params, target, source, value, n_heads)
    out = jax.block_until_ready(out)

    ref = _reference_forward(params, target, source, value, n_heads)
    assert out.shape == (B, L, d_llm), out.shape
    max_err = float(jnp.max(jnp.abs(out - ref)))
    # Slightly loose tolerance: softmax denominator uses the EUP approximate reciprocal.
    assert jnp.allclose(out, ref, atol=2e-3, rtol=2e-3), max_err

    print("KERNEL_OK")
</pallas_src>

<mosaic_0001>
module attributes {stable_mosaic.version = 11 : i64} {
  func.func @_prep_kernel(%arg0: i32, %arg1: memref<128x128xf32, #tpu.memory_space<vmem>>, %arg2: memref<128x128xf32, #tpu.memory_space<vmem>>, %arg3: memref<1x8x128xf32, #tpu.memory_space<vmem>>, %arg4: memref<1x8x1xf32, #tpu.memory_space<vmem>>, %arg5: memref<1x128x8xf32, #tpu.memory_space<vmem>>, %arg6: memref<1x1x8xf32, #tpu.memory_space<vmem>>, %arg7: memref<1x8x128xf32, #tpu.memory_space<vmem>>, %arg8: memref<1x8x128xf32, #tpu.memory_space<vmem>>, %arg9: memref<1x128x128xf32, #tpu.memory_space<vmem>>) attributes {dimension_semantics = [#tpu.dimension_semantics<parallel>], iteration_bounds = array<i64: 4>, scalar_prefetch = 0 : i64, scratch_operands = 0 : i64, tpu.core_type = #tpu.core_type<tc>, window_params = [{pipeline_mode = #tpu.pipeline_mode<synchronous>, transform_indices = @transform_0, window_bounds = array<i64: 128, 128>}, {pipeline_mode = #tpu.pipeline_mode<synchronous>, transform_indices = @transform_1, window_bounds = array<i64: 128, 128>}, {transform_indices = @transform_2, window_bounds = array<i64: 1, 8, 128>}, {transform_indices = @transform_3, window_bounds = array<i64: 1, 8, 1>}, {transform_indices = @transform_4, window_bounds = array<i64: 1, 128, 8>}, {transform_indices = @transform_5, window_bounds = array<i64: 1, 1, 8>}, {transform_indices = @transform_6, window_bounds = array<i64: 1, 8, 128>}, {transform_indices = @transform_7, window_bounds = array<i64: 1, 8, 128>}, {transform_indices = @transform_8, window_bounds = array<i64: 1, 128, 128>}]} {
    %c0 = arith.constant 0 : index
    %c0_0 = arith.constant 0 : index
    %c0_1 = arith.constant 0 : index
    %0 = vector.load %arg3[%c0, %c0_0, %c0_1] : memref<1x8x128xf32, #tpu.memory_space<vmem>>, vector<1x8x128xf32>
    %1 = vector.shape_cast %0 : vector<1x8x128xf32> to vector<8x128xf32>
    %c0_2 = arith.constant 0 : index
    %c0_3 = arith.constant 0 : index
    %2 = vector.load %arg1[%c0_2, %c0_3] : memref<128x128xf32, #tpu.memory_space<vmem>>, vector<128x128xf32>
    %cst = arith.constant dense<0.000000e+00> : vector<8x128xf32>
    %3 = tpu.matmul %1, %2, %cst {dimension_numbers = #tpu.dot_dimension_numbers<[1], [1], [0], [0], [0, 0, 1, 0], [], []>} : vector<8x128xf32>, vector<128x128xf32>, vector<8x128xf32> -> vector<8x128xf32>
    %c0_4 = arith.constant 0 : index
    %c0_5 = arith.constant 0 : index
    %c0_6 = arith.constant 0 : index
    %4 = vector.load %arg4[%c0_4, %c0_5, %c0_6] : memref<1x8x1xf32, #tpu.memory_space<vmem>>, vector<1x8x1xf32>
    %5 = vector.shape_cast %4 : vector<1x8x1xf32> to vector<8x1xf32>
    %6 = vector.broadcast %5 : vector<8x1xf32> to vector<8x128xf32>
    %7 = arith.addf %3, %6 : vector<8x128xf32>
    %c0_7 = arith.constant 0 : index
    %c0_8 = arith.constant 0 : index
    %c0_9 = arith.constant 0 : index
    %8 = vector.load %arg8[%c0_7, %c0_8, %c0_9] : memref<1x8x128xf32, #tpu.memory_space<vmem>>, vector<1x8x128xf32>
    %9 = vector.shape_cast %8 : vector<1x8x128xf32> to vector<8x128xf32>
    %10 = vector.shape_cast %7 : vector<8x128xf32> to vector<1x8x128xf32>
    tpu.vector_store %arg8[%c0_7, %c0_8, %c0_9], %10 {strides = array<i32>} : memref<1x8x128xf32, #tpu.memory_space<vmem>>, vector<1x8x128xf32>,
    %c0_10 = arith.constant 0 : index
    %c0_11 = arith.constant 0 : index
    %11 = vector.load %arg2[%c0_10, %c0_11] : memref<128x128xf32, #tpu.memory_space<vmem>>, vector<128x128xf32>
    %c0_12 = arith.constant 0 : index
    %c0_13 = arith.constant 0 : index
    %c0_14 = arith.constant 0 : index
    %12 = vector.load %arg5[%c0_12, %c0_13, %c0_14] : memref<1x128x8xf32, #tpu.memory_space<vmem>>, vector<1x128x8xf32>
    %13 = vector.shape_cast %12 : vector<1x128x8xf32> to vector<128x8xf32>
    %cst_15 = arith.constant dense<0.000000e+00> : vector<128x8xf32>
    %14 = tpu.matmul %11, %13, %cst_15 {dimension_numbers = #tpu.dot_dimension_numbers<[1], [0], [0], [1], [0, 0, 1, 1], [], []>} : vector<128x128xf32>, vector<128x8xf32>, vector<128x8xf32> -> vector<128x8xf32>
    %c0_16 = arith.constant 0 : index
    %c0_17 = arith.constant 0 : index
    %c0_18 = arith.constant 0 : index
    %15 = vector.load %arg6[%c0_16, %c0_17, %c0_18] : memref<1x1x8xf32, #tpu.memory_space<vmem>>, vector<1x1x8xf32>
    %16 = vector.shape_cast %15 : vector<1x1x8xf32> to vector<1x8xf32>
    %17 = vector.broadcast %16 : vector<1x8xf32> to vector<128x8xf32>
    %18 = arith.addf %14, %17 : vector<128x8xf32>
    %c0_19 = arith.constant 0 : index
    %c0_20 = arith.constant 0 : index
    %c0_21 = arith.constant 0 : index
    %19 = vector.load %arg7[%c0_19, %c0_20, %c0_21] : memref<1x8x128xf32, #tpu.memory_space<vmem>>, vector<1x8x128xf32>
    %20 = vector.shape_cast %19 : vector<1x8x128xf32> to vector<8x128xf32>
    %cst_22 = arith.constant dense<0.000000e+00> : vector<128x128xf32>
    %21 = tpu.matmul %18, %20, %cst_22 {dimension_numbers = #tpu.dot_dimension_numbers<[1], [0], [0], [1], [0, 0, 1, 1], [], []>} : vector<128x8xf32>, vector<8x128xf32>, vector<128x128xf32> -> vector<128x128xf32>
    %c0_23 = arith.constant 0 : index
    %c0_24 = arith.constant 0 : index
    %c0_25 = arith.constant 0 : index
    %22 = vector.load %arg9[%c0_23, %c0_24, %c0_25] : memref<1x128x128xf32, #tpu.memory_space<vmem>>, vector<1x128x128xf32>
    %23 = vector.shape_cast %22 : vector<1x128x128xf32> to vector<128x128xf32>
    %24 = vector.shape_cast %21 : vector<128x128xf32> to vector<1x128x128xf32>
    tpu.vector_store %arg9[%c0_23, %c0_24, %c0_25], %24 {strides = array<i32>} : memref<1x128x128xf32, #tpu.memory_space<vmem>>, vector<1x128x128xf32>,
    return
  }
  func.func @transform_0(%arg0: i32) -> (i32, i32) {
    %c0_i32 = arith.constant 0 : i32
    %c0_i32_0 = arith.constant 0 : i32
    %c0_i32_1 = arith.constant 0 : i32
    return %c0_i32, %c0_i32_0 : i32, i32
  }
  func.func @transform_1(%arg0: i32) -> (i32, i32) {
    %c0_i32 = arith.constant 0 : i32
    %c0_i32_0 = arith.constant 0 : i32
    %c0_i32_1 = arith.constant 0 : i32
    return %c0_i32, %c0_i32_0 : i32, i32
  }
  func.func @transform_2(%arg0: i32) -> (i32, i32, i32) {
    %c0_i32 = arith.constant 0 : i32
    %c0_i32_0 = arith.constant 0 : i32
    %c0_i32_1 = arith.constant 0 : i32
    return %arg0, %c0_i32, %c0_i32_0 : i32, i32, i32
  }
  func.func @transform_3(%arg0: i32) -> (i32, i32, i32) {
    %c0_i32 = arith.constant 0 : i32
    %c0_i32_0 = arith.constant 0 : i32
    %c0_i32_1 = arith.constant 0 : i32
    return %arg0, %c0_i32, %c0_i32_0 : i32, i32, i32
  }
  func.func @transform_4(%arg0: i32) -> (i32, i32, i32) {
    %c0_i32 = arith.constant 0 : i32
    %c0_i32_0 = arith.constant 0 : i32
    %c0_i32_1 = arith.constant 0 : i32
    return %arg0, %c0_i32, %c0_i32_0 : i32, i32, i32
  }
  func.func @transform_5(%arg0: i32) -> (i32, i32, i32) {
    %c0_i32 = arith.constant 0 : i32
    %c0_i32_0 = arith.constant 0 : i32
    %c0_i32_1 = arith.constant 0 : i32
    return %arg0, %c0_i32, %c0_i32_0 : i32, i32, i32
  }
  func.func @transform_6(%arg0: i32) -> (i32, i32, i32) {
    %c0_i32 = arith.constant 0 : i32
    %c0_i32_0 = arith.constant 0 : i32
    %c0_i32_1 = arith.constant 0 : i32
    return %arg0, %c0_i32, %c0_i32_0 : i32, i32, i32
  }
  func.func @transform_7(%arg0: i32) -> (i32, i32, i32) {
    %c0_i32 = arith.constant 0 : i32
    %c0_i32_0 = arith.constant 0 : i32
    %c0_i32_1 = arith.constant 0 : i32
    return %arg0, %c0_i32, %c0_i32_0 : i32, i32, i32
  }
  func.func @transform_8(%arg0: i32) -> (i32, i32, i32) {
    %c0_i32 = arith.constant 0 : i32
    %c0_i32_0 = arith.constant 0 : i32
    %c0_i32_1 = arith.constant 0 : i32
    return %arg0, %c0_i32, %c0_i32_0 : i32, i32, i32
  }
}

module attributes {stable_mosaic.version = 11 : i64} {
  func.func @_attn_kernel(%arg0: i32, %arg1: memref<16x32xf32, #tpu.memory_space<vmem>>, %arg2: memref<4x8x128xf32, #tpu.memory_space<vmem>>, %arg3: memref<4x128x128xf32, #tpu.memory_space<vmem>>, %arg4: memref<4x32x8xf32, #tpu.memory_space<vmem>>, %arg5: memref<4x1x8xf32, #tpu.memory_space<vmem>>, %arg6: memref<1x128xf32, #tpu.memory_space<vmem>>, %arg7: memref<1x128xf32, #tpu.memory_space<vmem>>, %arg8: memref<16x128xf32, #tpu.memory_space<vmem>>, %arg9: memref<16x128xf32, #tpu.memory_space<vmem>>) attributes {dimension_semantics = [#tpu.dimension_semantics<parallel>], iteration_bounds = array<i64: 1>, scalar_prefetch = 0 : i64, scratch_operands = 1 : i64, tpu.core_type = #tpu.core_type<tc>, window_params = [{transform_indices = @transform_0, window_bounds = array<i64: 16, 32>}, {pipeline_mode = #tpu.pipeline_mode<synchronous>, transform_indices = @transform_1, window_bounds = array<i64: 4, 8, 128>}, {pipeline_mode = #tpu.pipeline_mode<synchronous>, transform_indices = @transform_2, window_bounds = array<i64: 4, 128, 128>}, {pipeline_mode = #tpu.pipeline_mode<synchronous>, transform_indices = @transform_3, window_bounds = array<i64: 4, 32, 8>}, {pipeline_mode = #tpu.pipeline_mode<synchronous>, transform_indices = @transform_4, window_bounds = array<i64: 4, 1, 8>}, {pipeline_mode = #tpu.pipeline_mode<synchronous>, transform_indices = @transform_5, window_bounds = array<i64: 1, 128>}, {pipeline_mode = #tpu.pipeline_mode<synchronous>, transform_indices = @transform_6, window_bounds = array<i64: 1, 128>}, {transform_indices = @transform_7, window_bounds = array<i64: 16, 128>}]} {
    %c0 = arith.constant 0 : index
    %c0_0 = arith.constant 0 : index
    %0 = vector.load %arg1[%c0, %c0_0] : memref<16x32xf32, #tpu.memory_space<vmem>>, vector<16x32xf32>
    %c0_1 = arith.constant 0 : index
    %c0_2 = arith.constant 0 : index
    %1 = vector.load %arg6[%c0_1, %c0_2] : memref<1x128xf32, #tpu.memory_space<vmem>>, vector<1x128xf32>
    %cst = arith.constant 0.000000e+00 : f32
    %2 = vector.broadcast %cst : f32 to vector<16x128xf32>
    %c0_3 = arith.constant 0 : index
    %c0_4 = arith.constant 0 : index
    %3 = vector.load %arg9[%c0_3, %c0_4] : memref<16x128xf32, #tpu.memory_space<vmem>>, vector<16x128xf32>
    tpu.vector_store %arg9[%c0_3, %c0_4], %2 {strides = array<i32>} : memref<16x128xf32, #tpu.memory_space<vmem>>, vector<16x128xf32>,
    %c0_i32 = arith.constant 0 : i32
    %4 = arith.index_cast %c0_i32 : i32 to index
    %c0_5 = arith.constant 0 : index
    %c0_6 = arith.constant 0 : index
    %5 = vector.load %arg4[%4, %c0_5, %c0_6] : memref<4x32x8xf32, #tpu.memory_space<vmem>>, vector<1x32x8xf32>
    %6 = vector.shape_cast %5 : vector<1x32x8xf32> to vector<32x8xf32>
    %cst_7 = arith.constant dense<0.000000e+00> : vector<16x8xf32>
    %7 = tpu.matmul %0, %6, %cst_7 {dimension_numbers = #tpu.dot_dimension_numbers<[1], [0], [0], [1], [0, 0, 1, 1], [], []>} : vector<16x32xf32>, vector<32x8xf32>, vector<16x8xf32> -> vector<16x8xf32>
    %8 = arith.index_cast %c0_i32 : i32 to index
    %c0_8 = arith.constant 0 : index
    %c0_9 = arith.constant 0 : index
    %9 = vector.load %arg5[%8, %c0_8, %c0_9] : memref<4x1x8xf32, #tpu.memory_space<vmem>>, vector<1x1x8xf32>
    %10 = vector.shape_cast %9 : vector<1x1x8xf32> to vector<1x8xf32>
    %11 = vector.broadcast %10 : vector<1x8xf32> to vector<16x8xf32>
    %12 = arith.addf %7, %11 : vector<16x8xf32>
    %cst_10 = arith.constant 0.353553385 : f32
    %13 = vector.broadcast %cst_10 : f32 to vector<16x8xf32>
    %14 = arith.mulf %12, %13 : vector<16x8xf32>
    %15 = arith.index_cast %c0_i32 : i32 to index
    %c0_11 = arith.constant 0 : index
    %c0_12 = arith.constant 0 : index
    %16 = vector.load %arg2[%15, %c0_11, %c0_12] : memref<4x8x128xf32, #tpu.memory_space<vmem>>, vector<1x8x128xf32>
    %17 = vector.shape_cast %16 : vector<1x8x128xf32> to vector<8x128xf32>
    %cst_13 = arith.constant dense<0.000000e+00> : vector<16x128xf32>
    %18 = tpu.matmul %14, %17, %cst_13 {dimension_numbers = #tpu.dot_dimension_numbers<[1], [0], [0], [1], [0, 0, 1, 1], [], []>} : vector<16x8xf32>, vector<8x128xf32>, vector<16x128xf32> -> vector<16x128xf32>
    %19 = vector.broadcast %1 : vector<1x128xf32> to vector<16x128xf32>
    %20 = arith.addf %18, %19 : vector<16x128xf32>
    %cst_14 = arith.constant dense<0xFF800000> : vector<16xf32>
    %21 = vector.multi_reduction <maximumf>, %20, %cst_14 [1] : vector<16x128xf32> to vector<16xf32>
    %22 = vector.shape_cast %21 : vector<16xf32> to vector<16x1xf32>
    %23 = vector.broadcast %22 : vector<16x1xf32> to vector<16x128xf32>
    %24 = arith.subf %20, %23 : vector<16x128xf32>
    %25 = math.exp %24 : vector<16x128xf32>
    %cst_15 = arith.constant dense<0.000000e+00> : vector<16xf32>
    %26 = vector.multi_reduction <add>, %25, %cst_15 [1] : vector<16x128xf32> to vector<16xf32>
    %27 = vector.shape_cast %26 : vector<16xf32> to vector<16x1xf32>
    %28 = tpu.reciprocal %27 {approx = true} : vector<16x1xf32> -> vector<16x1xf32>
    %29 = vector.broadcast %28 : vector<16x1xf32> to vector<16x128xf32>
    %30 = arith.mulf %25, %29 : vector<16x128xf32>
    %c0_16 = arith.constant 0 : index
    %c0_17 = arith.constant 0 : index
    %31 = vector.load %arg9[%c0_16, %c0_17] : memref<16x128xf32, #tpu.memory_space<vmem>>, vector<16x128xf32>
    %32 = arith.index_cast %c0_i32 : i32 to index
    %c0_18 = arith.constant 0 : index
    %c0_19 = arith.constant 0 : index
    %33 = vector.load %arg3[%32, %c0_18, %c0_19] : memref<4x128x128xf32, #tpu.memory_space<vmem>>, vector<1x128x128xf32>
    %34 = vector.shape_cast %33 : vector<1x128x128xf32> to vector<128x128xf32>
    %cst_20 = arith.constant dense<0.000000e+00> : vector<16x128xf32>
    %35 = tpu.matmul %30, %34, %cst_20 {dimension_numbers = #tpu.dot_dimension_numbers<[1], [0], [0], [1], [0, 0, 1, 1], [], []>} : vector<16x128xf32>, vector<128x128xf32>, vector<16x128xf32> -> vector<16x128xf32>
    %36 = arith.addf %31, %35 : vector<16x128xf32>
    %c0_21 = arith.constant 0 : index
    %c0_22 = arith.constant 0 : index
    %37 = vector.load %arg9[%c0_21, %c0_22] : memref<16x128xf32, #tpu.memory_space<vmem>>, vector<16x128xf32>
    tpu.vector_store %arg9[%c0_21, %c0_22], %36 {strides = array<i32>} : memref<16x128xf32, #tpu.memory_space<vmem>>, vector<16x128xf32>,
    %c1_i32 = arith.constant 1 : i32
    %38 = arith.index_cast %c1_i32 : i32 to index
    %c0_23 = arith.constant 0 : index
    %c0_24 = arith.constant 0 : index
    %39 = vector.load %arg4[%38, %c0_23, %c0_24] : memref<4x32x8xf32, #tpu.memory_space<vmem>>, vector<1x32x8xf32>
    %40 = vector.shape_cast %39 : vector<1x32x8xf32> to vector<32x8xf32>
    %cst_25 = arith.constant dense<0.000000e+00> : vector<16x8xf32>
    %41 = tpu.matmul %0, %40, %cst_25 {dimension_numbers = #tpu.dot_dimension_numbers<[1], [0], [0], [1], [0, 0, 1, 1], [], []>} : vector<16x32xf32>, vector<32x8xf32>, vector<16x8xf32> -> vector<16x8xf32>
    %42 = arith.index_cast %c1_i32 : i32 to index
    %c0_26 = arith.constant 0 : index
    %c0_27 = arith.constant 0 : index
    %43 = vector.load %arg5[%42, %c0_26, %c0_27] : memref<4x1x8xf32, #tpu.memory_space<vmem>>, vector<1x1x8xf32>
    %44 = vector.shape_cast %43 : vector<1x1x8xf32> to vector<1x8xf32>
    %45 = vector.broadcast %44 : vector<1x8xf32> to vector<16x8xf32>
    %46 = arith.addf %41, %45 : vector<16x8xf32>
    %cst_28 = arith.constant 0.353553385 : f32
    %47 = vector.broadcast %cst_28 : f32 to vector<16x8xf32>
    %48 = arith.mulf %46, %47 : vector<16x8xf32>
    %49 = arith.index_cast %c1_i32 : i32 to index
    %c0_29 = arith.constant 0 : index
    %c0_30 = arith.constant 0 : index
    %50 = vector.load %arg2[%49, %c0_29, %c0_30] : memref<4x8x128xf32, #tpu.memory_space<vmem>>, vector<1x8x128xf32>
    %51 = vector.shape_cast %50 : vector<1x8x128xf32> to vector<8x128xf32>
    %cst_31 = arith.constant dense<0.000000e+00> : vector<16x128xf32>
    %52 = tpu.matmul %48, %51, %cst_31 {dimension_numbers = #tpu.dot_dimension_numbers<[1], [0], [0], [1], [0, 0, 1, 1], [], []>} : vector<16x8xf32>, vector<8x128xf32>, vector<16x128xf32> -> vector<16x128xf32>
    %53 = vector.broadcast %1 : vector<1x128xf32> to vector<16x128xf32>
    %54 = arith.addf %52, %53 : vector<16x128xf32>
    %cst_32 = arith.constant dense<0xFF800000> : vector<16xf32>
    %55 = vector.multi_reduction <maximumf>, %54, %cst_32 [1] : vector<16x128xf32> to vector<16xf32>
    %56 = vector.shape_cast %55 : vector<16xf32> to vector<16x1xf32>
    %57 = vector.broadcast %56 : vector<16x1xf32> to vector<16x128xf32>
    %58 = arith.subf %54, %57 : vector<16x128xf32>
    %59 = math.exp %58 : vector<16x128xf32>
    %cst_33 = arith.constant dense<0.000000e+00> : vector<16xf32>
    %60 = vector.multi_reduction <add>, %59, %cst_33 [1] : vector<16x128xf32> to vector<16xf32>
    %61 = vector.shape_cast %60 : vector<16xf32> to vector<16x1xf32>
    %62 = tpu.reciprocal %61 {approx = true} : vector<16x1xf32> -> vector<16x1xf32>
    %63 = vector.broadcast %62 : vector<16x1xf32> to vector<16x128xf32>
    %64 = arith.mulf %59, %63 : vector<16x128xf32>
    %c0_34 = arith.constant 0 : index
    %c0_35 = arith.constant 0 : index
    %65 = vector.load %arg9[%c0_34, %c0_35] : memref<16x128xf32, #tpu.memory_space<vmem>>, vector<16x128xf32>
    %66 = arith.index_cast %c1_i32 : i32 to index
    %c0_36 = arith.constant 0 : index
    %c0_37 = arith.constant 0 : index
    %67 = vector.load %arg3[%66, %c0_36, %c0_37] : memref<4x128x128xf32, #tpu.memory_space<vmem>>, vector<1x128x128xf32>
    %68 = vector.shape_cast %67 : vector<1x128x128xf32> to vector<128x128xf32>
    %cst_38 = arith.constant dense<0.000000e+00> : vector<16x128xf32>
    %69 = tpu.matmul %64, %68, %cst_38 {dimension_numbers = #tpu.dot_dimension_numbers<[1], [0], [0], [1], [0, 0, 1, 1], [], []>} : vector<16x128xf32>, vector<128x128xf32>, vector<16x128xf32> -> vector<16x128xf32>
    %70 = arith.addf %65, %69 : vector<16x128xf32>
    %c0_39 = arith.constant 0 : index
    %c0_40 = arith.constant 0 : index
    %71 = vector.load %arg9[%c0_39, %c0_40] : memref<16x128xf32, #tpu.memory_space<vmem>>, vector<16x128xf32>
    tpu.vector_store %arg9[%c0_39, %c0_40], %70 {strides = array<i32>} : memref<16x128xf32, #tpu.memory_space<vmem>>, vector<16x128xf32>,
    %c2_i32 = arith.constant 2 : i32
    %72 = arith.index_cast %c2_i32 : i32 to index
    %c0_41 = arith.constant 0 : index
    %c0_42 = arith.constant 0 : index
    %73 = vector.load %arg4[%72, %c0_41, %c0_42] : memref<4x32x8xf32, #tpu.memory_space<vmem>>, vector<1x32x8xf32>
    %74 = vector.shape_cast %73 : vector<1x32x8xf32> to vector<32x8xf32>
    %cst_43 = arith.constant dense<0.000000e+00> : vector<16x8xf32>
    %75 = tpu.matmul %0, %74, %cst_43 {dimension_numbers = #tpu.dot_dimension_numbers<[1], [0], [0], [1], [0, 0, 1, 1], [], []>} : vector<16x32xf32>, vector<32x8xf32>, vector<16x8xf32> -> vector<16x8xf32>
    %76 = arith.index_cast %c2_i32 : i32 to index
    %c0_44 = arith.constant 0 : index
    %c0_45 = arith.constant 0 : index
    %77 = vector.load %arg5[%76, %c0_44, %c0_45] : memref<4x1x8xf32, #tpu.memory_space<vmem>>, vector<1x1x8xf32>
    %78 = vector.shape_cast %77 : vector<1x1x8xf32> to vector<1x8xf32>
    %79 = vector.broadcast %78 : vector<1x8xf32> to vector<16x8xf32>
    %80 = arith.addf %75, %79 : vector<16x8xf32>
    %cst_46 = arith.constant 0.353553385 : f32
    %81 = vector.broadcast %cst_46 : f32 to vector<16x8xf32>
    %82 = arith.mulf %80, %81 : vector<16x8xf32>
    %83 = arith.index_cast %c2_i32 : i32 to index
    %c0_47 = arith.constant 0 : index
    %c0_48 = arith.constant 0 : index
    %84 = vector.load %arg2[%83, %c0_47, %c0_48] : memref<4x8x128xf32, #tpu.memory_space<vmem>>, vector<1x8x128xf32>
    %85 = vector.shape_cast %84 : vector<1x8x128xf32> to vector<8x128xf32>
    %cst_49 = arith.constant dense<0.000000e+00> : vector<16x128xf32>
    %86 = tpu.matmul %82, %85, %cst_49 {dimension_numbers = #tpu.dot_dimension_numbers<[1], [0], [0], [1], [0, 0, 1, 1], [], []>} : vector<16x8xf32>, vector<8x128xf32>, vector<16x128xf32> -> vector<16x128xf32>
    %87 = vector.broadcast %1 : vector<1x128xf32> to vector<16x128xf32>
    %88 = arith.addf %86, %87 : vector<16x128xf32>
    %cst_50 = arith.constant dense<0xFF800000> : vector<16xf32>
    %89 = vector.multi_reduction <maximumf>, %88, %cst_50 [1] : vector<16x128xf32> to vector<16xf32>
    %90 = vector.shape_cast %89 : vector<16xf32> to vector<16x1xf32>
    %91 = vector.broadcast %90 : vector<16x1xf32> to vector<16x128xf32>
    %92 = arith.subf %88, %91 : vector<16x128xf32>
    %93 = math.exp %92 : vector<16x128xf32>
    %cst_51 = arith.constant dense<0.000000e+00> : vector<16xf32>
    %94 = vector.multi_reduction <add>, %93, %cst_51 [1] : vector<16x128xf32> to vector<16xf32>
    %95 = vector.shape_cast %94 : vector<16xf32> to vector<16x1xf32>
    %96 = tpu.reciprocal %95 {approx = true} : vector<16x1xf32> -> vector<16x1xf32>
    %97 = vector.broadcast %96 : vector<16x1xf32> to vector<16x128xf32>
    %98 = arith.mulf %93, %97 : vector<16x128xf32>
    %c0_52 = arith.constant 0 : index
    %c0_53 = arith.constant 0 : index
    %99 = vector.load %arg9[%c0_52, %c0_53] : memref<16x128xf32, #tpu.memory_space<vmem>>, vector<16x128xf32>
    %100 = arith.index_cast %c2_i32 : i32 to index
    %c0_54 = arith.constant 0 : index
    %c0_55 = arith.constant 0 : index
    %101 = vector.load %arg3[%100, %c0_54, %c0_55] : memref<4x128x128xf32, #tpu.memory_space<vmem>>, vector<1x128x128xf32>
    %102 = vector.shape_cast %101 : vector<1x128x128xf32> to vector<128x128xf32>
    %cst_56 = arith.constant dense<0.000000e+00> : vector<16x128xf32>
    %103 = tpu.matmul %98, %102, %cst_56 {dimension_numbers = #tpu.dot_dimension_numbers<[1], [0], [0], [1], [0, 0, 1, 1], [], []>} : vector<16x128xf32>, vector<128x128xf32>, vector<16x128xf32> -> vector<16x128xf32>
    %104 = arith.addf %99, %103 : vector<16x128xf32>
    %c0_57 = arith.constant 0 : index
    %c0_58 = arith.constant 0 : index
    %105 = vector.load %arg9[%c0_57, %c0_58] : memref<16x128xf32, #tpu.memory_space<vmem>>, vector<16x128xf32>
    tpu.vector_store %arg9[%c0_57, %c0_58], %104 {strides = array<i32>} : memref<16x128xf32, #tpu.memory_space<vmem>>, vector<16x128xf32>,
    %c3_i32 = arith.constant 3 : i32
    %106 = arith.index_cast %c3_i32 : i32 to index
    %c0_59 = arith.constant 0 : index
    %c0_60 = arith.constant 0 : index
    %107 = vector.load %arg4[%106, %c0_59, %c0_60] : memref<4x32x8xf32, #tpu.memory_space<vmem>>, vector<1x32x8xf32>
    %108 = vector.shape_cast %107 : vector<1x32x8xf32> to vector<32x8xf32>
    %cst_61 = arith.constant dense<0.000000e+00> : vector<16x8xf32>
    %109 = tpu.matmul %0, %108, %cst_61 {dimension_numbers = #tpu.dot_dimension_numbers<[1], [0], [0], [1], [0, 0, 1, 1], [], []>} : vector<16x32xf32>, vector<32x8xf32>, vector<16x8xf32> -> vector<16x8xf32>
    %110 = arith.index_cast %c3_i32 : i32 to index
    %c0_62 = arith.constant 0 : index
    %c0_63 = arith.constant 0 : index
    %111 = vector.load %arg5[%110, %c0_62, %c0_63] : memref<4x1x8xf32, #tpu.memory_space<vmem>>, vector<1x1x8xf32>
    %112 = vector.shape_cast %111 : vector<1x1x8xf32> to vector<1x8xf32>
    %113 = vector.broadcast %112 : vector<1x8xf32> to vector<16x8xf32>
    %114 = arith.addf %109, %113 : vector<16x8xf32>
    %cst_64 = arith.constant 0.353553385 : f32
    %115 = vector.broadcast %cst_64 : f32 to vector<16x8xf32>
    %116 = arith.mulf %114, %115 : vector<16x8xf32>
    %117 = arith.index_cast %c3_i32 : i32 to index
    %c0_65 = arith.constant 0 : index
    %c0_66 = arith.constant 0 : index
    %118 = vector.load %arg2[%117, %c0_65, %c0_66] : memref<4x8x128xf32, #tpu.memory_space<vmem>>, vector<1x8x128xf32>
    %119 = vector.shape_cast %118 : vector<1x8x128xf32> to vector<8x128xf32>
    %cst_67 = arith.constant dense<0.000000e+00> : vector<16x128xf32>
    %120 = tpu.matmul %116, %119, %cst_67 {dimension_numbers = #tpu.dot_dimension_numbers<[1], [0], [0], [1], [0, 0, 1, 1], [], []>} : vector<16x8xf32>, vector<8x128xf32>, vector<16x128xf32> -> vector<16x128xf32>
    %121 = vector.broadcast %1 : vector<1x128xf32> to vector<16x128xf32>
    %122 = arith.addf %120, %121 : vector<16x128xf32>
    %cst_68 = arith.constant dense<0xFF800000> : vector<16xf32>
    %123 = vector.multi_reduction <maximumf>, %122, %cst_68 [1] : vector<16x128xf32> to vector<16xf32>
    %124 = vector.shape_cast %123 : vector<16xf32> to vector<16x1xf32>
    %125 = vector.broadcast %124 : vector<16x1xf32> to vector<16x128xf32>
    %126 = arith.subf %122, %125 : vector<16x128xf32>
    %127 = math.exp %126 : vector<16x128xf32>
    %cst_69 = arith.constant dense<0.000000e+00> : vector<16xf32>
    %128 = vector.multi_reduction <add>, %127, %cst_69 [1] : vector<16x128xf32> to vector<16xf32>
    %129 = vector.shape_cast %128 : vector<16xf32> to vector<16x1xf32>
    %130 = tpu.reciprocal %129 {approx = true} : vector<16x1xf32> -> vector<16x1xf32>
    %131 = vector.broadcast %130 : vector<16x1xf32> to vector<16x128xf32>
    %132 = arith.mulf %127, %131 : vector<16x128xf32>
    %c0_70 = arith.constant 0 : index
    %c0_71 = arith.constant 0 : index
    %133 = vector.load %arg9[%c0_70, %c0_71] : memref<16x128xf32, #tpu.memory_space<vmem>>, vector<16x128xf32>
    %134 = arith.index_cast %c3_i32 : i32 to index
    %c0_72 = arith.constant 0 : index
    %c0_73 = arith.constant 0 : index
    %135 = vector.load %arg3[%134, %c0_72, %c0_73] : memref<4x128x128xf32, #tpu.memory_space<vmem>>, vector<1x128x128xf32>
    %136 = vector.shape_cast %135 : vector<1x128x128xf32> to vector<128x128xf32>
    %cst_74 = arith.constant dense<0.000000e+00> : vector<16x128xf32>
    %137 = tpu.matmul %132, %136, %cst_74 {dimension_numbers = #tpu.dot_dimension_numbers<[1], [0], [0], [1], [0, 0, 1, 1], [], []>} : vector<16x128xf32>, vector<128x128xf32>, vector<16x128xf32> -> vector<16x128xf32>
    %138 = arith.addf %133, %137 : vector<16x128xf32>
    %c0_75 = arith.constant 0 : index
    %c0_76 = arith.constant 0 : index
    %139 = vector.load %arg9[%c0_75, %c0_76] : memref<16x128xf32, #tpu.memory_space<vmem>>, vector<16x128xf32>
    tpu.vector_store %arg9[%c0_75, %c0_76], %138 {strides = array<i32>} : memref<16x128xf32, #tpu.memory_space<vmem>>, vector<16x128xf32>,
    %c4_i32 = arith.constant 4 : i32
    %c0_77 = arith.constant 0 : index
    %c0_78 = arith.constant 0 : index
    %140 = vector.load %arg9[%c0_77, %c0_78] : memref<16x128xf32, #tpu.memory_space<vmem>>, vector<16x128xf32>
    %c0_79 = arith.constant 0 : index
    %c0_80 = arith.constant 0 : index
    %141 = vector.load %arg7[%c0_79, %c0_80] : memref<1x128xf32, #tpu.memory_space<vmem>>, vector<1x128xf32>
    %142 = vector.broadcast %141 : vector<1x128xf32> to vector<16x128xf32>
    %143 = arith.addf %140, %142 : vector<16x128xf32>
    %c0_81 = arith.constant 0 : index
    %c0_82 = arith.constant 0 : index
    %144 = vector.load %arg8[%c0_81, %c0_82] : memref<16x128xf32, #tpu.memory_space<vmem>>, vector<16x128xf32>
    tpu.vector_store %arg8[%c0_81, %c0_82], %143 {strides = array<i32>} : memref<16x128xf32, #tpu.memory_space<vmem>>, vector<16x128xf32>,
    return
  }
  func.func @transform_0(%arg0: i32) -> (i32, i32) {
    %c0_i32 = arith.constant 0 : i32
    %c0_i32_0 = arith.constant 0 : i32
    return %arg0, %c0_i32 : i32, i32
  }
  func.func @transform_1(%arg0: i32) -> (i32, i32, i32) {
    %c0_i32 = arith.constant 0 : i32
    %c0_i32_0 = arith.constant 0 : i32
    %c0_i32_1 = arith.constant 0 : i32
    %c0_i32_2 = arith.constant 0 : i32
    return %c0_i32, %c0_i32_0, %c0_i32_1 : i32, i32, i32
  }
  func.func @transform_2(%arg0: i32) -> (i32, i32, i32) {
    %c0_i32 = arith.constant 0 : i32
    %c0_i32_0 = arith.constant 0 : i32
    %c0_i32_1 = arith.constant 0 : i32
    %c0_i32_2 = arith.constant 0 : i32
    return %c0_i32, %c0_i32_0, %c0_i32_1 : i32, i32, i32
  }
  func.func @transform_3(%arg0: i32) -> (i32, i32, i32) {
    %c0_i32 = arith.constant 0 : i32
    %c0_i32_0 = arith.constant 0 : i32
    %c0_i32_1 = arith.constant 0 : i32
    %c0_i32_2 = arith.constant 0 : i32
    return %c0_i32, %c0_i32_0, %c0_i32_1 : i32, i32, i32
  }
  func.func @transform_4(%arg0: i32) -> (i32, i32, i32) {
    %c0_i32 = arith.constant 0 : i32
    %c0_i32_0 = arith.constant 0 : i32
    %c0_i32_1 = arith.constant 0 : i32
    %c0_i32_2 = arith.constant 0 : i32
    return %c0_i32, %c0_i32_0, %c0_i32_1 : i32, i32, i32
  }
  func.func @transform_5(%arg0: i32) -> (i32, i32) {
    %c0_i32 = arith.constant 0 : i32
    %c0_i32_0 = arith.constant 0 : i32
    %c0_i32_1 = arith.constant 0 : i32
    return %c0_i32, %c0_i32_0 : i32, i32
  }
  func.func @transform_6(%arg0: i32) -> (i32, i32) {
    %c0_i32 = arith.constant 0 : i32
    %c0_i32_0 = arith.constant 0 : i32
    %c0_i32_1 = arith.constant 0 : i32
    return %c0_i32, %c0_i32_0 : i32, i32
  }
  func.func @transform_7(%arg0: i32) -> (i32, i32) {
    %c0_i32 = arith.constant 0 : i32
    %c0_i32_0 = arith.constant 0 : i32
    return %arg0, %c0_i32 : i32, i32
  }
}

</mosaic_0001>

<bundles_post_ra>
// kernel: reprogramming_layer_forward.2
= control target key start
LH: loop header
LB: loop body
LE: loop exit
PB: predicated region body
PF: predicated region fallthrough
CT: control target
= control target key end

     0   :  { %s1347_s27 = smov 0   ;;  %s1550_s0 = inlined_call_operand.vmem [shape: f32[128,128], index: 0, kind: input, shape index: {}]   ;;  %s1551_s1 = inlined_call_operand.vmem [shape: f32[128,128], index: 1, kind: input, shape index: {}]   ;;  %s1552_s2 = inlined_call_operand.vmem [shape: f32[4,8,128], index: 2, kind: input, shape index: {}]   ;;  %s1553_s3 = inlined_call_operand.vmem [shape: f32[4,8,1], index: 3, kind: input, shape index: {}]   ;;  %s1554_s4 = inlined_call_operand.vmem [shape: f32[4,128,8], index: 4, kind: input, shape index: {}]   ;;  %s1555_s5 = inlined_call_operand.vmem [shape: f32[4,1,8], index: 5, kind: input, shape index: {}]   ;;  %s1556_s6 = inlined_call_operand.vmem [shape: f32[4,8,128], index: 6, kind: input, shape index: {}]   ;;  %s1557_s7 = inlined_call_operand.vmem [shape: f32[4,8,128], index: 7, kind: output, shape index: {0}]   ;;  %s1558_s8 = inlined_call_operand.vmem [shape: f32[4,128,128], index: 8, kind: output, shape index: {1}]  }
   0x1 LB: > { %s1002_s28 = sadd.s32 4294967295, %s1296_s27   ;;  %p1006_p0 = scmp.ge.s32.totalorder %s1296_s27, 1  ;;  %s1296_s27 = sphi %s1347_s27, %s19_s27  }
   0x2   : > { %p300_p1 = scmp.lt.s32.totalorder %s1296_s27, 5 }
   0x4   : > { %p301_p2 = pnand %p1006_p0, %p300_p1 }
   0x5   : > { %p353_p3 = scmp.lt.s32.totalorder (!%p301_p2), %s1002_s28, 3  ;;  %v476_v0 = vld [vmem:[%s1551_s1] sm:$0xff] (!%p301_p2)  ;;  %v1298_v1 = vmov (!%p301_p2), 0.0|0.0   ;;  %vm1299_vm0 = vmmov (!%p301_p2), 0   ;;  %v1300_v2 = vmov (!%p301_p2), 0.0   ;;  %v384_v4 = vld [vmem:[%s1550_s0 + $0x8] sm:$0xff] (!%p301_p2) }
   0x6   : > { %304 = sbr.rel (%p301_p2) target bundleno = 509 (0x1fd), region = 48  ;;  %1169 = vmatprep.mubr.f32.mxu1 (!%p301_p2), %v476_v0  ;;  %1219 = vmatprep.subr.bf16.mxu0 (!%p301_p2), %v1298_v1  ;;  %v383_v3 = vld [vmem:[%s1550_s0] sm:$0xff] (!%p301_p2)  ;;  %v385_v15 = vld [vmem:[%s1550_s0 + $0x10] sm:$0xff] (!%p301_p2)  ;;  %v386_v16 = vld [vmem:[%s1550_s0 + $0x18] sm:$0xff] (!%p301_p2)  ;;  %vm661_vm1 = vcmask (!%p301_p2), 64512  }
   0x7   : > { %1134 = vmatprep.mubr.msk.f32.mxu0 (!%p301_p2), %vm1299_vm0, %v1300_v2  ;;  %v1220_v8 = vpack.c.bf16 (!%p301_p2), %v384_v4, %v383_v3  ;;  %v1223_v19 = vpack.c.bf16 (!%p301_p2), %v386_v16, %v385_v15  ;;  %v387_v23 = vld [vmem:[%s1550_s0 + $0x20] sm:$0xff] (!%p301_p2)  ;;  %v388_v24 = vld [vmem:[%s1550_s0 + $0x28] sm:$0xff] (!%p301_p2)  ;;  %v389_v32 = vld [vmem:[%s1550_s0 + $0x30] sm:$0xff] (!%p301_p2)  ;;  %v1301_v4 = vmov (!%p301_p2), 0  }
   0x8   : > { %v1226_v28 = vpack.c.bf16 (!%p301_p2), %v388_v24, %v387_v23  ;;  %v390_v33 = vld [vmem:[%s1550_s0 + $0x38] sm:$0xff] (!%p301_p2)  ;;  %v391_v39 = vld [vmem:[%s1550_s0 + $0x40] sm:$0xff] (!%p301_p2)  ;;  %v392_v40 = vld [vmem:[%s1550_s0 + $0x48] sm:$0xff] (!%p301_p2)  ;;  %1289 = vset.pattern.permute.xlu0 (!%p301_p2), %v1301_v4 }
   0x9   : > { %1221 = vmatpush3.bf16.xpose.msra.mxu0 (!%p301_p2), %v1220_v8  ;;  %v1229_v37 = vpack.c.bf16 (!%p301_p2), %v390_v33, %v389_v32  ;;  %v1232_v41 = vpack.c.bf16 (!%p301_p2), %v392_v40, %v391_v39  ;;  %v477_v42 = vld [vmem:[%s1551_s1 + $0x8] sm:$0xff] (!%p301_p2)  ;;  %v478_v44 = vld [vmem:[%s1551_s1 + $0x10] sm:$0xff] (!%p301_p2)  ;;  %v394_v46 = vld [vmem:[%s1550_s0 + $0x58] sm:$0xff] (!%p301_p2) }
   0xa   : > { %1222 = vmatprep.subr.bf16.mxu0 (!%p301_p2), %v1298_v1  ;;  %v393_v45 = vld [vmem:[%s1550_s0 + $0x50] sm:$0xff] (!%p301_p2)  ;;  %v479_v47 = vld [vmem:[%s1551_s1 + $0x18] sm:$0xff] (!%p301_p2)  ;;  %v480_v48 = vld [vmem:[%s1551_s1 + $0x20] sm:$0xff] (!%p301_p2) }
   0xb   : > { %v1235_v49 = vpack.c.bf16 (!%p301_p2), %v394_v46, %v393_v45  ;;  %v481_v50 = vld [vmem:[%s1551_s1 + $0x28] sm:$0xff] (!%p301_p2)  ;;  %v482_v51 = vld [vmem:[%s1551_s1 + $0x30] sm:$0xff] (!%p301_p2)  ;;  %v395_v52 = vld [vmem:[%s1550_s0 + $0x60] sm:$0xff] (!%p301_p2) }
   0xc   : > { %v396_v53 = vld [vmem:[%s1550_s0 + $0x68] sm:$0xff] (!%p301_p2)  ;;  %v483_v54 = vld [vmem:[%s1551_s1 + $0x38] sm:$0xff] (!%p301_p2)  ;;  %v484_v55 = vld [vmem:[%s1551_s1 + $0x40] sm:$0xff] (!%p301_p2) }
   0xd   : > { %s1560_s28 = smov (!%p353_p3, %s1002_s28), 3  ;;  %v1238_v56 = vpack.c.bf16 %v396_v53, %v395_v52  ;;  %v485_v57 = vld [vmem:[%s1551_s1 + $0x48] sm:$0xff]  ;;  %v486_v58 = vld [vmem:[%s1551_s1 + $0x50] sm:$0xff]  ;;  %v398_v60 = vld [vmem:[%s1550_s0 + $0x78] sm:$0xff] }
   0xe   : > { %s1034_s9 = sshll.u32 %s1560_s28, 7  ;;  %s1420_s15 = sshll.u32 %s1560_s28, 3  ;;  %v397_v59 = vld [vmem:[%s1550_s0 + $0x70] sm:$0xff]  ;;  %v487_v61 = vld [vmem:[%s1551_s1 + $0x58] sm:$0xff]  ;;  %v488_v62 = vld [vmem:[%s1551_s1 + $0x60] sm:$0xff] }
   0xf   : > { %s1367_s12 = scalar_lea.vmem %s1554_s4, %s1034_s9  ;;  %s372_s17 = scalar_lea.vmem %s1556_s6, %s1420_s15  ;;  %v1241_v63 = vpack.c.bf16 %v398_v60, %v397_v59  ;;  %v489_v0 = vld [vmem:[%s1551_s1 + $0x68] sm:$0xff]  ;;  %v491_v2 = vld [vmem:[%s1551_s1 + $0x78] sm:$0xff] }
  0x10   : > { %v492_v5 = vld [vmem:[%s1367_s12] sm:$0xff]  ;;  %v493_v6 = vld [vmem:[%s1367_s12 + $0x8] sm:$0xff]  ;;  %v494_v7 = vld [vmem:[%s1367_s12 + $0x10] sm:$0xff]  ;;  %s356_s26 = scalar_lea.vmem %s1552_s2, %s1420_s15  ;;  %s360_s10 = scalar_lea.vmem %s1553_s3, %s1420_s15 }
  0x11   : > { %v1243_v9 = vpack.c.bf16 %v493_v6, %v492_v5  ;;  %v495_v10 = vld [vmem:[%s1367_s12 + $0x18] sm:$0xff]  ;;  %v496_v12 = vld [vmem:[%s1367_s12 + $0x20] sm:$0xff]  ;;  %v497_v13 = vld [vmem:[%s1367_s12 + $0x28] sm:$0xff]  ;;  %1224 = vmatpush3.bf16.xpose.msra.mxu0 %v1223_v19  ;;  %s368_s14 = scalar_lea.vmem %s1555_s5, %s1560_s28  ;;  %s1529_s20 = scalar_lea.vmem %s1558_s8, %s1034_s9 }
  0x12   : > { %v1247_v11 = vpack.c.bf16 %v495_v10, %v494_v7  ;;  %v1251_v14 = vpack.c.bf16 %v497_v13, %v496_v12  ;;  %v498_v17 = vld [vmem:[%s1367_s12 + $0x30] sm:$0xff]  ;;  %v499_v18 = vld [vmem:[%s1367_s12 + $0x38] sm:$0xff]  ;;  %v500_v21 = vld [vmem:[%s1367_s12 + $0x40] sm:$0xff]  ;;  %1225 = vmatprep.subr.bf16.mxu0 %v1298_v1 }
  0x13   : > { %1244 = vmatprep.subr.bf16.mxu1 %v1243_v9  ;;  %v1255_v20 = vpack.c.bf16 %v499_v18, %v498_v17  ;;  %v501_v22 = vld [vmem:[%s1367_s12 + $0x48] sm:$0xff]  ;;  %v502_v26 = vld [vmem:[%s1367_s12 + $0x50] sm:$0xff]  ;;  %v503_v27 = vld [vmem:[%s1367_s12 + $0x58] sm:$0xff] }
  0x14   : > { %1246 = vmatpush3.bf16.msra.mxu1 %v1243_v9  ;;  %v1259_v25 = vpack.c.bf16 %v501_v22, %v500_v21  ;;  %v1263_v29 = vpack.c.bf16 %v503_v27, %v502_v26  ;;  %v504_v30 = vld [vmem:[%s1367_s12 + $0x60] sm:$0xff]  ;;  %v505_v31 = vld [vmem:[%s1367_s12 + $0x68] sm:$0xff]  ;;  %v506_v35 = vld [vmem:[%s1367_s12 + $0x70] sm:$0xff] }
  0x15   : > { %1248 = vmatprep.subr.bf16.mxu1 %v1247_v11  ;;  %v1267_v34 = vpack.c.bf16 %v505_v31, %v504_v30  ;;  %v507_v36 = vld [vmem:[%s1367_s12 + $0x78] sm:$0xff]  ;;  %v660_v43 = vld [vmem:[%s372_s17] sm:$0xff]  ;;  %s376_s17 = scalar_lea.vmem %s1557_s7, %s1420_s15 }
  0x16   : > { %v1271_v38 = vpack.c.bf16 %v507_v36, %v506_v35  ;;  %v382_v3 = vld [vmem:[%s356_s26] sm:$0xff] }
  0x17   : > { %v399_v5 = vld [vmem:[%s360_s10] sm:$0xff] }
  0x18   : > { %1250 = vmatpush3.bf16.msra.mxu1 %v1247_v11  ;;  %402 = vperm.xlu0 %1289, %v399_v5   ;;  %v1015_v6 = vld [vmem:[%s368_s14] ss:$0 sm:$0xff] }
  0x19   : > { %1252 = vmatprep.subr.bf16.mxu1 %v1251_v14  ;;  %1227 = vmatpush3.bf16.xpose.msra.mxu0 %v1226_v28 }
  0x1a   : > { %1228 = vmatprep.subr.bf16.mxu0 %v1298_v1 }
  0x1c   : > { %1254 = vmatpush3.bf16.msra.mxu1 %v1251_v14 }
  0x1d   : > { %1256 = vmatprep.subr.bf16.mxu1 %v1255_v20 }
  0x20   : > { %1258 = vmatpush3.bf16.msra.mxu1 %v1255_v20 }
  0x21   : > { %1260 = vmatprep.subr.bf16.mxu1 %v1259_v25  ;;  %1230 = vmatpush3.bf16.xpose.msra.mxu0 %v1229_v37 }
  0x22   : > { %1231 = vmatprep.subr.bf16.mxu0 %v1298_v1 }
  0x24   : > { %1262 = vmatpush3.bf16.msra.mxu1 %v1259_v25 }
  0x25   : > { %1264 = vmatprep.subr.bf16.mxu1 %v1263_v29 }
  0x28   : > { %1266 = vmatpush3.bf16.msra.mxu1 %v1263_v29 }
  0x29   : > { %1268 = vmatprep.subr.bf16.mxu1 %v1267_v34  ;;  %1233 = vmatpush3.bf16.xpose.msra.mxu0 %v1232_v41 }
  0x2a   : > { %1234 = vmatprep.subr.bf16.mxu0 %v1298_v1 }
  0x2c   : > { %1270 = vmatpush3.bf16.msra.mxu1 %v1267_v34 }
  0x2d   : > { %1272 = vmatprep.subr.bf16.mxu1 %v1271_v38 }
  0x30   : > { %1274 = vmatpush3.bf16.msra.mxu1 %v1271_v38 }
  0x31   : > { %1275 = vmatprep.subr.mxu1 %v660_v43  ;;  %1236 = vmatpush3.bf16.xpose.msra.mxu0 %v1235_v49 }
  0x32   : > { %1237 = vmatprep.subr.bf16.mxu0 %v1298_v1 }
  0x33   : > { %1170 = vmatmul.mubr.f32.vlgmr.msra.gmra.mrb[0].mxu1 %v477_v42 }
  0x34   : > { %1172 = vmatprep.mubr.f32.mxu1 %v478_v44  ;;  %1276 = vmatpush3.msra.mxu1 %v660_v43 }
  0x37   : > { %1173 = vmatmul.mubr.f32.gmra.mrb[2].mxu1 %v479_v47 }
  0x38   : > { %1175 = vmatprep.mubr.f32.mxu1 %v480_v48 }
  0x39   : > { %1239 = vmatpush3.bf16.xpose.msra.mxu0 %v1238_v56 }
  0x3a   : > { %1240 = vmatprep.subr.bf16.mxu0 %v1298_v1  ;;  %v490_v1 = vld [vmem:[%s1551_s1 + $0x70] sm:$0xff] }
  0x3b   : > { %1176 = vmatmul.mubr.f32.gmra.mrb[4].mxu1 %v481_v50 }
  0x3c   : > { %1178 = vmatprep.mubr.f32.mxu1 %v482_v51 }
  0x3f   : > { %1179 = vmatmul.mubr.f32.gmra.mrb[6].mxu1 %v483_v54 }
  0x40   : > { %1181 = vmatprep.mubr.f32.mxu1 %v484_v55 }
  0x41   : > { %1242 = vmatpush3.bf16.xpose.msra.mxu0 %v1241_v63 }
  0x42   : > { %1193 = vmatprep.subr.mxu0 %v660_v43 }
  0x43   : > { %1182 = vmatmul.mubr.f32.gmra.mrb[8].mxu1 %v485_v57 }
  0x44   : > { %1184 = vmatprep.mubr.f32.mxu1 %v486_v58 }
  0x47   : > { %1185 = vmatmul.mubr.f32.gmra.mrb[10].mxu1 %v487_v61 }
  0x48   : > { %1187 = vmatprep.mubr.f32.mxu1 %v488_v62  ;;  %1135 = vmatmul.mubr.f32.vlgmr.msra.gmra.mrb[0].mxu0 %v382_v3 }
  0x49   : > { %1194 = vmatpush3.msra.mxu0 %v660_v43 }
  0x4b   : > { %1188 = vmatmul.mubr.f32.gmra.mrb[12].mxu1 %v489_v0 }
  0x4c   : > { %1190 = vmatprep.mubr.f32.mxu1 %v490_v1 }
  0x4f   : > { %1191 = vmatmul.mubr.f32.gmra.mrb[14].mxu1 %v491_v2 }
  0x97   : > { %v403_v41 = vpop.permute.xlu0 %402 }
 0x106   : > { %v1171_v7 = vpop.f32.mrb[0].mxu1 }
 0x107   : > { %v587_v8 = vadd.f32 %v1171_v7, %v1015_v6  ;;  %v581_v9 = vpop.f32.mrb[1].mxu1 }
 0x108   : > { %v582_v10 = vadd.f32 %v1015_v6, %v581_v9 }
 0x10a   : > { %v1174_v11 = vpop.f32.mrb[2].mxu1  ;;  %1195 = vmatprep.mubr.msk.f32.mxu0 %vm661_vm1, %v582_v10 }
 0x10b   : > { %v597_v12 = vadd.f32 %v1174_v11, %v1015_v6  ;;  %v591_v13 = vpop.f32.mrb[3].mxu1  ;;  %1196 = vmatmul.mubr.msk.f32.vlgmr.msra.gmra.mrb[2].mxu0 %vm661_vm1, %v587_v8 }
 0x10c   : > { %v592_v14 = vadd.f32 %v1015_v6, %v591_v13 }
 0x10e   : > { %v1177_v15 = vpop.f32.mrb[4].mxu1  ;;  %1198 = vmatprep.mubr.msk.f32.mxu0 %vm661_vm1, %v592_v14 }
 0x10f   : > { %v607_v16 = vadd.f32 %v1177_v15, %v1015_v6  ;;  %v601_v17 = vpop.f32.mrb[5].mxu1  ;;  %1199 = vmatmul.mubr.msk.f32.gmra.mrb[4].mxu0 %vm661_vm1, %v597_v12 }
 0x110   : > { %v602_v18 = vadd.f32 %v1015_v6, %v601_v17 }
 0x112   : > { %v1180_v19 = vpop.f32.mrb[6].mxu1  ;;  %1201 = vmatprep.mubr.msk.f32.mxu0 %vm661_vm1, %v602_v18 }
 0x113   : > { %v617_v20 = vadd.f32 %v1180_v19, %v1015_v6  ;;  %v611_v21 = vpop.f32.mrb[7].mxu1  ;;  %1202 = vmatmul.mubr.msk.f32.gmra.mrb[6].mxu0 %vm661_vm1, %v607_v16 }
 0x114   : > { %v612_v22 = vadd.f32 %v1015_v6, %v611_v21 }
 0x116   : > { %v1183_v23 = vpop.f32.mrb[8].mxu1  ;;  %1204 = vmatprep.mubr.msk.f32.mxu1 %vm661_vm1, %v612_v22 }
 0x117   : > { %v627_v24 = vadd.f32 %v1183_v23, %v1015_v6  ;;  %v621_v25 = vpop.f32.mrb[9].mxu1  ;;  %1205 = vmatmul.mubr.msk.f32.vlgmr.msra.gmra.mrb[16].mxu1 %vm661_vm1, %v617_v20 }
 0x118   : > { %v622_v26 = vadd.f32 %v1015_v6, %v621_v25 }
 0x11a   : > { %v1186_v27 = vpop.f32.mrb[10].mxu1  ;;  %1207 = vmatprep.mubr.msk.f32.mxu1 %vm661_vm1, %v622_v26 }
 0x11b   : > { %v637_v28 = vadd.f32 %v1186_v27, %v1015_v6  ;;  %v631_v29 = vpop.f32.mrb[11].mxu1  ;;  %1208 = vmatmul.mubr.msk.f32.gmra.mrb[18].mxu1 %vm661_vm1, %v627_v24  ;;  %v471_v39 = vpop.f32.mrb[0].mxu0 }
 0x11c   : > { %v632_v30 = vadd.f32 %v1015_v6, %v631_v29  ;;  %v1136_v40 = vpop.f32.mrb[1].mxu0  ;;  %v472_v42 = vadd.f32 %v471_v39, %v403_v41 }
 0x11e   : > { %v1189_v31 = vpop.f32.mrb[12].mxu1  ;;  %1210 = vmatprep.mubr.msk.f32.mxu1 %vm661_vm1, %v632_v30  ;;  %475 = vst [vmem:[%s376_s17] sm:$0xff] %v472_v42 }
 0x11f   : > { %v647_v32 = vadd.f32 %v1189_v31, %v1015_v6  ;;  %v641_v33 = vpop.f32.mrb[13].mxu1  ;;  %1211 = vmatmul.mubr.msk.f32.gmra.mrb[20].mxu1 %vm661_vm1, %v637_v28 }
 0x120   : > { %v642_v34 = vadd.f32 %v1015_v6, %v641_v33 }
 0x122   : > { %v1192_v35 = vpop.f32.mrb[14].mxu1  ;;  %1213 = vmatprep.mubr.msk.f32.mxu1 %vm661_vm1, %v642_v34 }
 0x123   : > { %v657_v36 = vadd.f32 %v1192_v35, %v1015_v6  ;;  %v651_v37 = vpop.f32.mrb[15].mxu1  ;;  %1214 = vmatmul.mubr.msk.f32.gmra.mrb[22].mxu1 %vm661_vm1, %v647_v32 }
 0x124   : > { %v652_v38 = vadd.f32 %v1015_v6, %v651_v37 }
 0x126   : > { %1216 = vmatprep.mubr.msk.f32.mxu1 %vm661_vm1, %v652_v38 }
 0x127   : > { %1217 = vmatmul.mubr.msk.f32.gmra.mrb[24].mxu1 %vm661_vm1, %v657_v36 }
 0x1de   : > { %v1197_v43 = vpop.f32.mrb[2].mxu0 }
 0x1df   : > { %856 = vst [vmem:[%s1529_s20 + $0x8] sm:$0xff] %v1197_v43  ;;  %v776_v44 = vpop.f32.mrb[3].mxu0 }
 0x1e0   : > { %855 = vst [vmem:[%s1529_s20] sm:$0xff] %v776_v44 }
 0x1e2   : > { %v1200_v45 = vpop.f32.mrb[4].mxu0 }
 0x1e3   : > { %858 = vst [vmem:[%s1529_s20 + $0x18] sm:$0xff] %v1200_v45  ;;  %v786_v46 = vpop.f32.mrb[5].mxu0 }
 0x1e4   : > { %857 = vst [vmem:[%s1529_s20 + $0x10] sm:$0xff] %v786_v46 }
 0x1e6   : > { %v1203_v47 = vpop.f32.mrb[6].mxu0 }
 0x1e7   : > { %860 = vst [vmem:[%s1529_s20 + $0x28] sm:$0xff] %v1203_v47  ;;  %v796_v48 = vpop.f32.mrb[7].mxu0 }
 0x1e8   : > { %859 = vst [vmem:[%s1529_s20 + $0x20] sm:$0xff] %v796_v48 }
 0x1ea   : > { %v1206_v49 = vpop.f32.mrb[16].mxu1 }
 0x1eb   : > { %862 = vst [vmem:[%s1529_s20 + $0x38] sm:$0xff] %v1206_v49  ;;  %v806_v50 = vpop.f32.mrb[17].mxu1 }
 0x1ec   : > { %861 = vst [vmem:[%s1529_s20 + $0x30] sm:$0xff] %v806_v50 }
 0x1ee   : > { %v1209_v51 = vpop.f32.mrb[18].mxu1 }
 0x1ef   : > { %864 = vst [vmem:[%s1529_s20 + $0x48] sm:$0xff] %v1209_v51  ;;  %v816_v52 = vpop.f32.mrb[19].mxu1 }
 0x1f0   : > { %863 = vst [vmem:[%s1529_s20 + $0x40] sm:$0xff] %v816_v52 }
 0x1f2   : > { %v1212_v53 = vpop.f32.mrb[20].mxu1 }
 0x1f3   : > { %866 = vst [vmem:[%s1529_s20 + $0x58] sm:$0xff] %v1212_v53  ;;  %v826_v54 = vpop.f32.mrb[21].mxu1 }
 0x1f4   : > { %865 = vst [vmem:[%s1529_s20 + $0x50] sm:$0xff] %v826_v54 }
 0x1f6   : > { %v1215_v55 = vpop.f32.mrb[22].mxu1 }
 0x1f7   : > { %868 = vst [vmem:[%s1529_s20 + $0x68] sm:$0xff] %v1215_v55  ;;  %v836_v56 = vpop.f32.mrb[23].mxu1 }
 0x1f8   : > { %867 = vst [vmem:[%s1529_s20 + $0x60] sm:$0xff] %v836_v56 }
 0x1fa   : > { %v1218_v57 = vpop.f32.mrb[24].mxu1 }
 0x1fb   : > { %870 = vst [vmem:[%s1529_s20 + $0x78] sm:$0xff] %v1218_v57  ;;  %v846_v58 = vpop.f32.mrb[25].mxu1 }
 0x1fc   : > { %869 = vst [vmem:[%s1529_s20 + $0x70] sm:$0xff] %v846_v58 }
 0x1fd PF: > { %s19_s27 = sadd.s32 1, %s1296_s27  }
 0x1fe   : > { %p16_p4 = scmp.ge.s32.totalorder %s19_s27, 6  }
 0x200   :  { %18 = sbr.rel (!%p16_p4) target bundleno = 1 (0x1), region = 102 }

// kernel: reprogramming_layer_forward.3
= control target key start
LH: loop header
LB: loop body
LE: loop exit
PB: predicated region body
PF: predicated region fallthrough
CT: control target
= control target key end

     0   :  { %vm43_vm0 = vcmask 261120   ;;  %s2247_s0 = inlined_call_operand.vmem [shape: f32[16,32], index: 0, kind: input, shape index: {}]   ;;  %s2248_s1 = inlined_call_operand.vmem [shape: f32[4,8,128], index: 1, kind: input, shape index: {}]   ;;  %s2249_s2 = inlined_call_operand.vmem [shape: f32[4,128,128], index: 2, kind: input, shape index: {}]   ;;  %s2250_s3 = inlined_call_operand.vmem [shape: f32[4,32,8], index: 3, kind: input, shape index: {}]   ;;  %s2251_s4 = inlined_call_operand.vmem [shape: f32[4,1,8], index: 4, kind: input, shape index: {}]   ;;  %s2252_s5 = inlined_call_operand.vmem [shape: f32[1,128], index: 5, kind: input, shape index: {}]   ;;  %s2253_s6 = inlined_call_operand.vmem [shape: f32[1,128], index: 6, kind: input, shape index: {}]   ;;  %s2254_s7 = inlined_call_operand.hbm [shape: f32[16,128], index: 7, kind: output, shape index: {}]  }
   0x1   :  { %v32_v0 = vld [vmem:[%s2250_s3] sm:$0xff]  ;;  %v33_v1 = vld [vmem:[%s2250_s3 + $0x8] sm:$0xff]  ;;  %v34_v2 = vld [vmem:[%s2250_s3 + $0x10] sm:$0xff] }
   0x2   :  { %v1627_v3 = vpack.c.bf16 %v33_v1, %v32_v0  ;;  %v35_v4 = vld [vmem:[%s2250_s3 + $0x18] sm:$0xff]  ;;  %v1910_v5 = vld [vmem:[%s2247_s0] sm:$0xff] }
   0x3   :  { %v1631_v6 = vpack.c.bf16 %v35_v4, %v34_v2  ;;  %1431 = vmatprep.mubr.msk.f32.mxu0 %vm43_vm0, %v1910_v5 }
   0x4   :  { %12 = vsyncpa [#allocation4], 0  ;;  %1628 = vmatprep.subr.bf16.mxu0 %v1627_v3  ;;  %v1917_v7 = vld [vmem:[%s2247_s0 + $0x8] sm:$0xff]  ;;  %v127_v8 = vld [vmem:[%s2248_s1] sm:$0xff]  ;;  %vm134_vm1 = vcmask 64512   ;;  %s1852_s21 = smov [#allocation3]  }
   0x5   :  { %1630 = vmatpush3.bf16.msra.mxu0 %v1627_v3  ;;  %v1227_v9 = vld [vmem:[%s2251_s4] ss:$0 sm:$0xff]  ;;  %v237_v22 = vld [vmem:[%s2249_s2 + $0x8] sm:$0xff]  ;;  %v238_v23 = vld [vmem:[%s2249_s2 + $0x10] sm:$0xff]  ;;  %s1216_s22 = sshll.u32 %s1852_s21, 4  ;;  %s1217_s22 = int_to_ptr.vmem [resolvable:$true] %s1216_s22 }
   0x6   :  { %1632 = vmatprep.subr.bf16.mxu0 %v1631_v6  ;;  %v1932_v16 = vld [vmem:[%s2252_s5] ss:$0 sm:$0xff]  ;;  %v239_v25 = vld [vmem:[%s2249_s2 + $0x18] sm:$0xff]  ;;  %v241_v28 = vld [vmem:[%s2249_s2 + $0x28] sm:$0xff]  ;;  %s1828_s23 = scalar_lea.vmem %s1217_s22, 256  ;;  %p1833_p1 = scmp.lt.s32.totalorder %s1217_s22, %s1217_s22 }
   0x7   :  { %v236_v21 = vld [vmem:[%s2249_s2] sm:$0xff]  ;;  %v1639_v26 = vpack.c.bf16 %v239_v25, %v238_v23  ;;  %v242_v30 = vld [vmem:[%s2249_s2 + $0x30] sm:$0xff]  ;;  %v243_v31 = vld [vmem:[%s2249_s2 + $0x38] sm:$0xff]  ;;  %p1829_p0 = scmp.ne.s32.totalorder %s1217_s22, %s1828_s23  ;;  %p1834_p2 = scmp.lt.s32.totalorder %s1828_s23, %s1828_s23 }
   0x8   :  { %v1635_v24 = vpack.c.bf16 %v237_v22, %v236_v21  ;;  %v240_v27 = vld [vmem:[%s2249_s2 + $0x20] sm:$0xff]  ;;  %v1647_v32 = vpack.c.bf16 %v243_v31, %v242_v30  ;;  %v245_v42 = vld [vmem:[%s2249_s2 + $0x48] sm:$0xff]  ;;  %v246_v44 = vld [vmem:[%s2249_s2 + $0x50] sm:$0xff] }
   0x9   :  { %1634 = vmatpush3.bf16.msra.mxu0 %v1631_v6  ;;  %v1643_v29 = vpack.c.bf16 %v241_v28, %v240_v27  ;;  %v244_v41 = vld [vmem:[%s2249_s2 + $0x40] sm:$0xff]  ;;  %v247_v45 = vld [vmem:[%s2249_s2 + $0x58] sm:$0xff]  ;;  %v249_v48 = vld [vmem:[%s2249_s2 + $0x68] sm:$0xff]  ;;  %p1835_p3 = por %p1834_p2, %p1833_p1 }
   0xa   :  { %1434 = vmatprep.subr.mxu0 %v127_v8  ;;  %v1651_v43 = vpack.c.bf16 %v245_v42, %v244_v41  ;;  %v1655_v46 = vpack.c.bf16 %v247_v45, %v246_v44  ;;  %v248_v47 = vld [vmem:[%s2249_s2 + $0x60] sm:$0xff]  ;;  %v250_v49 = vld [vmem:[%s2249_s2 + $0x70] sm:$0xff]  ;;  %v251_v51 = vld [vmem:[%s2249_s2 + $0x78] sm:$0xff] }
   0xb   :  { %v1659_v50 = vpack.c.bf16 %v249_v48, %v248_v47  ;;  %v1663_v52 = vpack.c.bf16 %v251_v51, %v250_v49  ;;  %v1233_v53 = vld [vmem:[%s2250_s3 + $0x20] sm:$0xff]  ;;  %v1234_v54 = vld [vmem:[%s2250_s3 + $0x28] sm:$0xff]  ;;  %v1235_v60 = vld [vmem:[%s2250_s3 + $0x30] sm:$0xff]  ;;  %p1836_p4 = pnand %p1835_p3, %p1829_p0 }
   0xc   :  { %1432 = vmatmul.mubr.msk.f32.vlgmr.msra.gmra.mrb[0].mxu0 %vm43_vm0, %v1917_v7  ;;  %v1667_v55 = vpack.c.bf16 %v1234_v54, %v1233_v53  ;;  %v1236_v61 = vld [vmem:[%s2250_s3 + $0x38] sm:$0xff]  ;;  %v1241_v1 = vld [vmem:[%s2248_s1 + $0x8] sm:$0xff]  ;;  %v1260_v2 = vld [vmem:[%s2250_s3 + $0x40] sm:$0xff] }
   0xd   :  { %1435 = vmatpush3.msra.mxu0 %v127_v8  ;;  %v1671_v0 = vpack.c.bf16 %v1236_v61, %v1235_v60  ;;  %v1261_v3 = vld [vmem:[%s2250_s3 + $0x48] sm:$0xff]  ;;  %v1287_v21 = vld [vmem:[%s2250_s3 + $0x60] sm:$0xff] }
   0xe   :  { %1636 = vmatprep.subr.bf16.mxu0 %v1635_v24  ;;  %v1707_v4 = vpack.c.bf16 %v1261_v3, %v1260_v2  ;;  %v1288_v22 = vld [vmem:[%s2250_s3 + $0x68] sm:$0xff]  ;;  %v1265_v28 = vld [vmem:[%s2251_s4 + $0x2] ss:$0 sm:$0xff] }
   0xf   :  { %v1747_v23 = vpack.c.bf16 %v1288_v22, %v1287_v21  ;;  %v1244_v48 = vld [vmem:[%s2249_s2 + $0x80] sm:$0xff]  ;;  %v1245_v49 = vld [vmem:[%s2249_s2 + $0x88] sm:$0xff] }
  0x10   :  { %v1675_v51 = vpack.c.bf16 %v1245_v49, %v1244_v48  ;;  %v1248_v54 = vld [vmem:[%s2249_s2 + $0xa0] sm:$0xff] }
  0x11   :  { %v1252_v21 = vld [vmem:[%s2249_s2 + $0xc0] sm:$0xff] }
  0x12   :  { %1676 = vmatprep.subr.bf16.mxu1 %v1675_v51 }
  0x13   :  { %1678 = vmatpush3.bf16.msra.mxu1 %v1675_v51 }
  0xdf   :  { %v1433_v10 = vpop.f32.mrb[0].mxu0 }
  0xe0   :  { %v122_v11 = vadd.f32 %v1433_v10, %v1227_v9  ;;  %v116_v12 = vpop.f32.mrb[1].mxu0 }
  0xe1   :  { %v117_v13 = vadd.f32 %v1227_v9, %v116_v12  ;;  %v1238_v9 = vld [vmem:[%s2251_s4 + $0x1] ss:$0 sm:$0xff] }
  0xe2   :  { %v126_v15 = vmul.f32 0.35355338, %v122_v11 }
  0xe3   :  { %v125_v14 = vmul.f32 0.35355338, %v117_v13 }
  0xe5   :  { %1436 = vmatprep.mubr.msk.f32.mxu0 %vm134_vm1, %v125_v14  ;;  %v1262_v14 = vld [vmem:[%s2250_s3 + $0x50] sm:$0xff] }
  0xe6   :  { %1437 = vmatmul.mubr.msk.f32.vlgmr.msra.gmra.mrb[2].mxu0 %vm134_vm1, %v126_v15  ;;  %v1263_v15 = vld [vmem:[%s2250_s3 + $0x58] sm:$0xff] }
  0xe7   :  { %1638 = vmatpush3.bf16.msra.mxu0 %v1635_v24 }
  0xe8   :  { %1640 = vmatprep.subr.bf16.mxu0 %v1639_v26 }
  0xeb   :  { %1642 = vmatpush3.bf16.msra.mxu0 %v1639_v26 }
  0xec   :  { %1644 = vmatprep.subr.bf16.mxu0 %v1643_v29 }
  0xef   :  { %1646 = vmatpush3.bf16.msra.mxu0 %v1643_v29 }
  0xf0   :  { %1648 = vmatprep.subr.bf16.mxu0 %v1647_v32 }
  0xf3   :  { %1650 = vmatpush3.bf16.msra.mxu0 %v1647_v32 }
  0xf4   :  { %1652 = vmatprep.subr.bf16.mxu0 %v1651_v43 }
  0xf7   :  { %1654 = vmatpush3.bf16.msra.mxu0 %v1651_v43 }
  0xf8   :  { %1656 = vmatprep.subr.bf16.mxu0 %v1655_v46 }
  0xfb   :  { %1658 = vmatpush3.bf16.msra.mxu0 %v1655_v46 }
  0xfc   :  { %1660 = vmatprep.subr.bf16.mxu0 %v1659_v50 }
  0xff   :  { %1662 = vmatpush3.bf16.msra.mxu0 %v1659_v50  ;;  %v1246_v50 = vld [vmem:[%s2249_s2 + $0x90] sm:$0xff] }
 0x100   :  { %1664 = vmatprep.subr.bf16.mxu0 %v1663_v52 }
 0x103   :  { %1666 = vmatpush3.bf16.msra.mxu0 %v1663_v52  ;;  %v1247_v52 = vld [vmem:[%s2249_s2 + $0x98] sm:$0xff] }
 0x104   :  { %1668 = vmatprep.subr.bf16.mxu0 %v1667_v55  ;;  %v1679_v53 = vpack.c.bf16 %v1247_v52, %v1246_v50 }
 0x106   :  { %1680 = vmatprep.subr.bf16.mxu1 %v1679_v53 }
 0x107   :  { %1682 = vmatpush3.bf16.msra.mxu1 %v1679_v53  ;;  %v1275_v53 = vld [vmem:[%s2249_s2 + $0x120] sm:$0xff] }
 0x1b9   :  { %v1438_v17 = vpop.f32.mrb[2].mxu0 }
 0x1ba   :  { %v207_v18 = vpop.f32.mrb[3].mxu0  ;;  %v213_v20 = vadd.f32 %v1438_v17, %v1932_v16 }
 0x1bb   :  { %v208_v19 = vadd.f32 %v1932_v16, %v207_v18 }
 0x1bd   :  { %216 = vmax.xlane.f32.xlu0 %v208_v19 }
 0x1c1   :  { %218 = vmax.xlane.f32.xlu0 %v213_v20 }
 0x24a   :  { %v217_v33 = vpop.xlane.xlu0 %216 }
 0x24b   :  { %v220_v34 = vsub.f32 %v208_v19, %v217_v33  ;;  %v1711_v19 = vpack.c.bf16 %v1263_v15, %v1262_v14  ;;  %v1289_v33 = vld [vmem:[%s2250_s3 + $0x70] sm:$0xff] }
 0x24d   :  { %v222_v35 = vmul.f32 1.442695, %v220_v34  ;;  %v1290_v34 = vld [vmem:[%s2250_s3 + $0x78] sm:$0xff] }
 0x24e   :  { %v219_v36 = vpop.xlane.xlu0 %218 }
 0x24f   :  { %1796 = vpow2.f32 %v222_v35  ;;  %v221_v37 = vsub.f32 %v213_v20, %v219_v36  ;;  %v1268_v20 = vld [vmem:[%s2248_s1 + $0x10] sm:$0xff] }
 0x251   :  { %v224_v38 = vmul.f32 1.442695, %v221_v37  ;;  %v1751_v37 = vpack.c.bf16 %v1290_v34, %v1289_v33  ;;  %v1272_v33 = vld [vmem:[%s2249_s2 + $0x108] sm:$0xff] }
 0x253   :  { %1798 = vpow2.f32 %v224_v38  ;;  %v1295_v38 = vld [vmem:[%s2248_s1 + $0x18] sm:$0xff] }
 0x259   :  { %v1797_v39 = vpop.eup %1796 }
 0x25a   :  { %226 = vadd.xlane.f32.xlu1 %v1797_v39 }
 0x25d   :  { %v1799_v40 = vpop.eup %1798 }
 0x25e   :  { %228 = vadd.xlane.f32.xlu1 %v1799_v40 }
 0x2e7   :  { %v227_v56 = vpop.xlane.xlu1 %226 }
 0x2e8   :  { %1800 = vrcp.f32 %v227_v56 }
 0x2eb   :  { %v229_v57 = vpop.xlane.xlu1 %228 }
 0x2ec   :  { %1802 = vrcp.f32 %v229_v57  ;;  %v1250_v57 = vld [vmem:[%s2249_s2 + $0xb0] sm:$0xff] }
 0x2f2   :  { %v1801_v58 = vpop.eup %1800 }
 0x2f3   :  { %v232_v59 = vmul.f32 %v1801_v58, %v1797_v39  ;;  %v1251_v58 = vld [vmem:[%s2249_s2 + $0xb8] sm:$0xff] }
 0x2f5   :  { %1471 = vmatprep.mubr.f32.mxu0 %v232_v59  ;;  %v1687_v59 = vpack.c.bf16 %v1251_v58, %v1250_v57  ;;  %v1278_v57 = vld [vmem:[%s2249_s2 + $0x138] sm:$0xff] }
 0x2f6   :  { %v1803_v62 = vpop.eup %1802 }
 0x2f7   :  { %v233_v63 = vmul.f32 %v1803_v62, %v1799_v40 }
 0x2f9   :  { %1472 = vmatmul.mubr.f32.vlgmr.msra.gmra.mrb[4].mxu0 %v233_v63 }
 0x2fa   :  { %1670 = vmatpush3.bf16.msra.mxu0 %v1667_v55  ;;  %1482 = vmatprep.mubr.msk.f32.mxu0 %vm43_vm0, %v1910_v5  ;;  %v1249_v55 = vld [vmem:[%s2249_s2 + $0xa8] sm:$0xff] }
 0x2fb   :  { %1672 = vmatprep.subr.bf16.mxu0 %v1671_v0  ;;  %v1683_v56 = vpack.c.bf16 %v1249_v55, %v1248_v54  ;;  %v1276_v54 = vld [vmem:[%s2249_s2 + $0x128] sm:$0xff] }
 0x2fc   :  { %v1723_v55 = vpack.c.bf16 %v1276_v54, %v1275_v53 }
 0x2fd   :  { %1684 = vmatprep.subr.bf16.mxu1 %v1683_v56 }
 0x2fe   :  { %1674 = vmatpush3.bf16.msra.mxu0 %v1671_v0  ;;  %1686 = vmatpush3.bf16.msra.mxu1 %v1683_v56  ;;  %v1277_v56 = vld [vmem:[%s2249_s2 + $0x130] sm:$0xff] }
 0x2ff   :  { %1485 = vmatprep.subr.mxu0 %v1241_v1  ;;  %1688 = vmatprep.subr.bf16.mxu1 %v1687_v59  ;;  %v1727_v58 = vpack.c.bf16 %v1278_v57, %v1277_v56 }
 0x301   :  { %1483 = vmatmul.mubr.msk.f32.vlgmr.msra.gmra.mrb[6].mxu0 %vm43_vm0, %v1917_v7 }
 0x302   :  { %1486 = vmatpush3.msra.mxu0 %v1241_v1  ;;  %1690 = vmatpush3.bf16.msra.mxu1 %v1687_v59  ;;  %v1279_v59 = vld [vmem:[%s2249_s2 + $0x140] sm:$0xff] }
 0x303   :  { %1708 = vmatprep.subr.bf16.mxu0 %v1707_v4 }
 0x3cc   :  { %v2009_v6 = vpop.f32.mrb[4].mxu0 }
 0x3cd   :  { %v2011_v8 = vpop.f32.mrb[5].mxu0 }
 0x3d4   :  { %v1484_v10 = vpop.f32.mrb[6].mxu0 }
 0x3d5   :  { %v416_v11 = vadd.f32 %v1484_v10, %v1238_v9  ;;  %v410_v12 = vpop.f32.mrb[7].mxu0 }
 0x3d6   :  { %v411_v13 = vadd.f32 %v1238_v9, %v410_v12 }
 0x3d7   :  { %v420_v18 = vmul.f32 0.35355338, %v416_v11 }
 0x3d8   :  { %v419_v17 = vmul.f32 0.35355338, %v411_v13 }
 0x3da   :  { %1487 = vmatprep.mubr.msk.f32.mxu0 %vm134_vm1, %v419_v17 }
 0x3db   :  { %1488 = vmatmul.mubr.msk.f32.vlgmr.msra.gmra.mrb[8].mxu0 %vm134_vm1, %v420_v18 }
 0x3dc   :  { %1710 = vmatpush3.bf16.msra.mxu0 %v1707_v4  ;;  %1533 = vmatprep.mubr.msk.f32.mxu0 %vm43_vm0, %v1910_v5 }
 0x3dd   :  { %1712 = vmatprep.subr.bf16.mxu0 %v1711_v19 }
 0x3e0   :  { %1714 = vmatpush3.bf16.msra.mxu0 %v1711_v19 }
 0x3e1   :  { %1536 = vmatprep.subr.mxu0 %v1268_v20 }
 0x3e3   :  { %1534 = vmatmul.mubr.msk.f32.vlgmr.msra.gmra.mrb[10].mxu0 %vm43_vm0, %v1917_v7 }
 0x3e4   :  { %1537 = vmatpush3.msra.mxu0 %v1268_v20 }
 0x3e5   :  { %1748 = vmatprep.subr.bf16.mxu0 %v1747_v23 }
 0x4ae   :  { %v1489_v24 = vpop.f32.mrb[8].mxu0 }
 0x4af   :  { %v2038_v25 = vadd.f32 %v1489_v24, %v1932_v16  ;;  %v495_v26 = vpop.f32.mrb[9].mxu0  ;;  %v1255_v24 = vld [vmem:[%s2249_s2 + $0xd8] sm:$0xff] }
 0x4b0   :  { %v2041_v27 = vadd.f32 %v1932_v16, %v495_v26  ;;  %v1256_v26 = vld [vmem:[%s2249_s2 + $0xe0] sm:$0xff] }
 0x4b1   :  { %506 = vmax.xlane.f32.xlu1 %v2038_v25 }
 0x4b2   :  { %504 = vmax.xlane.f32.xlu0 %v2041_v27 }
 0x4b6   :  { %v1535_v29 = vpop.f32.mrb[10].mxu0 }
 0x4b7   :  { %v705_v30 = vadd.f32 %v1535_v29, %v1265_v28  ;;  %v699_v31 = vpop.f32.mrb[11].mxu0 }
 0x4b8   :  { %v700_v32 = vadd.f32 %v1265_v28, %v699_v31  ;;  %v1258_v28 = vld [vmem:[%s2249_s2 + $0xf0] sm:$0xff] }
 0x4b9   :  { %v709_v36 = vmul.f32 0.35355338, %v705_v30  ;;  %v1259_v30 = vld [vmem:[%s2249_s2 + $0xf8] sm:$0xff] }
 0x4ba   :  { %v708_v35 = vmul.f32 0.35355338, %v700_v32  ;;  %v1703_v31 = vpack.c.bf16 %v1259_v30, %v1258_v28  ;;  %v1271_v32 = vld [vmem:[%s2249_s2 + $0x100] sm:$0xff]  ;;  %v1309_v30 = vld [vmem:[%s2249_s2 + $0x1d8] sm:$0xff] }
 0x4bb   :  { %v1715_v34 = vpack.c.bf16 %v1272_v33, %v1271_v32  ;;  %v1310_v32 = vld [vmem:[%s2249_s2 + $0x1e0] sm:$0xff]  ;;  %v1311_v33 = vld [vmem:[%s2249_s2 + $0x1e8] sm:$0xff] }
 0x4bc   :  { %1538 = vmatprep.mubr.msk.f32.mxu0 %vm134_vm1, %v708_v35 }
 0x4bd   :  { %1539 = vmatmul.mubr.msk.f32.vlgmr.msra.gmra.mrb[12].mxu0 %vm134_vm1, %v709_v36 }
 0x4be   :  { %1750 = vmatpush3.bf16.msra.mxu0 %v1747_v23  ;;  %1584 = vmatprep.mubr.msk.f32.mxu0 %vm43_vm0, %v1910_v5  ;;  %v1292_v5 = vld [vmem:[%s2251_s4 + $0x3] ss:$0 sm:$0xff]  ;;  %v1254_v23 = vld [vmem:[%s2249_s2 + $0xd0] sm:$0xff] }
 0x4bf   :  { %1752 = vmatprep.subr.bf16.mxu0 %v1751_v37 }
 0x4c2   :  { %1754 = vmatpush3.bf16.msra.mxu0 %v1751_v37 }
 0x4c3   :  { %1587 = vmatprep.subr.mxu0 %v1295_v38 }
 0x4c5   :  { %1585 = vmatmul.mubr.msk.f32.vlgmr.msra.gmra.mrb[14].mxu0 %vm43_vm0, %v1917_v7 }
 0x4c6   :  { %1588 = vmatpush3.msra.mxu0 %v1295_v38 }
 0x53e   :  { %v507_v60 = vpop.xlane.xlu1 %506 }
 0x53f   :  { %v505_v61 = vpop.xlane.xlu0 %504  ;;  %v509_v62 = vsub.f32 %v2038_v25, %v507_v60  ;;  %v1695_v25 = vpack.c.bf16 %v1255_v24, %v1254_v23  ;;  %v1280_v60 = vld [vmem:[%s2249_s2 + $0x148] sm:$0xff]  ;;  %v1304_v24 = vld [vmem:[%s2249_s2 + $0x1b0] sm:$0xff] }
 0x540   :  { %v508_v63 = vsub.f32 %v2041_v27, %v505_v61  ;;  %v1257_v27 = vld [vmem:[%s2249_s2 + $0xe8] sm:$0xff]  ;;  %v1731_v61 = vpack.c.bf16 %v1280_v60, %v1279_v59 }
 0x541   :  { %v512_v2 = vmul.f32 1.442695, %v509_v62  ;;  %v1699_v29 = vpack.c.bf16 %v1257_v27, %v1256_v26  ;;  %v1281_v62 = vld [vmem:[%s2249_s2 + $0x150] sm:$0xff]  ;;  %v1306_v26 = vld [vmem:[%s2249_s2 + $0x1c0] sm:$0xff]  ;;  %v1307_v27 = vld [vmem:[%s2249_s2 + $0x1c8] sm:$0xff] }
 0x542   :  { %v510_v4 = vmul.f32 1.442695, %v508_v63  ;;  %v1282_v63 = vld [vmem:[%s2249_s2 + $0x158] sm:$0xff]  ;;  %v1771_v28 = vpack.c.bf16 %v1307_v27, %v1306_v26 }
 0x543   :  { %1804 = vpow2.f32 %v512_v2  ;;  %v1283_v2 = vld [vmem:[%s2249_s2 + $0x160] sm:$0xff] }
 0x544   :  { %1806 = vpow2.f32 %v510_v4 }
 0x54d   :  { %v1805_v17 = vpop.eup %1804 }
 0x54e   :  { %v1807_v18 = vpop.eup %1806 }
 0x590   :  { %v1540_v39 = vpop.f32.mrb[12].mxu0 }
 0x591   :  { %v790_v40 = vadd.f32 %v1540_v39, %v1932_v16  ;;  %v784_v41 = vpop.f32.mrb[13].mxu0 }
 0x592   :  { %v785_v42 = vadd.f32 %v1932_v16, %v784_v41 }
 0x593   :  { %795 = vmax.xlane.f32.xlu1 %v790_v40 }
 0x594   :  { %793 = vmax.xlane.f32.xlu0 %v785_v42 }
 0x598   :  { %v1586_v43 = vpop.f32.mrb[14].mxu0 }
 0x599   :  { %v994_v7 = vadd.f32 %v1586_v43, %v1292_v5  ;;  %v988_v44 = vpop.f32.mrb[15].mxu0 }
 0x59a   :  { %v989_v45 = vadd.f32 %v1292_v5, %v988_v44 }
 0x59b   :  { %v998_v47 = vmul.f32 0.35355338, %v994_v7 }
 0x59c   :  { %v997_v46 = vmul.f32 0.35355338, %v989_v45  ;;  %v1273_v45 = vld [vmem:[%s2249_s2 + $0x110] sm:$0xff] }
 0x59e   :  { %1589 = vmatprep.mubr.msk.f32.mxu0 %vm134_vm1, %v997_v46  ;;  %v1274_v46 = vld [vmem:[%s2249_s2 + $0x118] sm:$0xff] }
 0x59f   :  { %1590 = vmatmul.mubr.msk.f32.vlgmr.msra.gmra.mrb[16].mxu0 %vm134_vm1, %v998_v47  ;;  %v1719_v51 = vpack.c.bf16 %v1274_v46, %v1273_v45  ;;  %v1314_v45 = vld [vmem:[%s2253_s6] ss:$0 sm:$0xff] }
 0x620   :  { %v796_v0 = vpop.xlane.xlu1 %795 }
 0x621   :  { %v794_v1 = vpop.xlane.xlu0 %793  ;;  %v798_v3 = vsub.f32 %v790_v40, %v796_v0 }
 0x622   :  { %v797_v9 = vsub.f32 %v785_v42, %v794_v1  ;;  %v1735_v1 = vpack.c.bf16 %v1282_v63, %v1281_v62 }
 0x623   :  { %v801_v10 = vmul.f32 1.442695, %v798_v3  ;;  %v1284_v3 = vld [vmem:[%s2249_s2 + $0x168] sm:$0xff] }
 0x624   :  { %v799_v11 = vmul.f32 1.442695, %v797_v9  ;;  %v1739_v4 = vpack.c.bf16 %v1284_v3, %v1283_v2  ;;  %v1285_v9 = vld [vmem:[%s2249_s2 + $0x170] sm:$0xff] }
 0x625   :  { %1808 = vpow2.f32 %v801_v10  ;;  %v1286_v10 = vld [vmem:[%s2249_s2 + $0x178] sm:$0xff] }
 0x626   :  { %1810 = vpow2.f32 %v799_v11  ;;  %v1743_v11 = vpack.c.bf16 %v1286_v10, %v1285_v9 }
 0x62f   :  { %v2098_v19 = vpop.eup %1808 }
 0x630   :  { %v1811_v20 = vpop.eup %1810 }
 0x672   :  { %v1591_v12 = vpop.f32.mrb[16].mxu0 }
 0x673   :  { %v1079_v13 = vadd.f32 %v1591_v12, %v1932_v16  ;;  %v1073_v14 = vpop.f32.mrb[17].mxu0  ;;  %v1298_v12 = vld [vmem:[%s2249_s2 + $0x180] sm:$0xff] }
 0x674   :  { %v1074_v15 = vadd.f32 %v1932_v16, %v1073_v14  ;;  %v1253_v16 = vld [vmem:[%s2249_s2 + $0xc8] sm:$0xff] }
 0x675   :  { %1084 = vmax.xlane.f32.xlu1 %v1079_v13  ;;  %v1691_v22 = vpack.c.bf16 %v1253_v16, %v1252_v21  ;;  %v1302_v16 = vld [vmem:[%s2249_s2 + $0x1a0] sm:$0xff] }
 0x676   :  { %1082 = vmax.xlane.f32.xlu0 %v1074_v15 }
 0x677   :  { %1692 = vmatprep.subr.bf16.mxu1 %v1691_v22 }
 0x678   :  { %1694 = vmatpush3.bf16.msra.mxu1 %v1691_v22  ;;  %v1303_v22 = vld [vmem:[%s2249_s2 + $0x1a8] sm:$0xff] }
 0x679   :  { %516 = vadd.xlane.f32.xlu1 %v1805_v17  ;;  %1696 = vmatprep.subr.bf16.mxu1 %v1695_v25  ;;  %v1763_v23 = vpack.c.bf16 %v1303_v22, %v1302_v16 }
 0x67a   :  { %514 = vadd.xlane.f32.xlu0 %v1807_v18 }
 0x67c   :  { %1698 = vmatpush3.bf16.msra.mxu1 %v1695_v25 }
 0x67d   :  { %805 = vadd.xlane.f32.xlu1 %v2098_v19  ;;  %1700 = vmatprep.subr.bf16.mxu1 %v1699_v29 }
 0x67e   :  { %803 = vadd.xlane.f32.xlu0 %v1811_v20 }
 0x680   :  { %1702 = vmatpush3.bf16.msra.mxu1 %v1699_v29  ;;  %v1308_v29 = vld [vmem:[%s2249_s2 + $0x1d0] sm:$0xff] }
 0x681   :  { %1704 = vmatprep.subr.bf16.mxu1 %v1703_v31 }
 0x684   :  { %1706 = vmatpush3.bf16.msra.mxu1 %v1703_v31  ;;  %v1775_v31 = vpack.c.bf16 %v1309_v30, %v1308_v29 }
 0x685   :  { %1716 = vmatprep.subr.bf16.mxu1 %v1715_v34 }
 0x702   :  { %v1085_v35 = vpop.xlane.xlu1 %1084 }
 0x703   :  { %v1087_v36 = vsub.f32 %v1079_v13, %v1085_v35  ;;  %v1083_v37 = vpop.xlane.xlu0 %1082  ;;  %v1299_v13 = vld [vmem:[%s2249_s2 + $0x188] sm:$0xff]  ;;  %v1312_v35 = vld [vmem:[%s2249_s2 + $0x1f0] sm:$0xff] }
 0x704   :  { %v1086_v38 = vsub.f32 %v1074_v15, %v1083_v37  ;;  %v1755_v14 = vpack.c.bf16 %v1299_v13, %v1298_v12 }
 0x705   :  { %v1090_v39 = vmul.f32 1.442695, %v1087_v36  ;;  %v1313_v36 = vld [vmem:[%s2249_s2 + $0x1f8] sm:$0xff] }
 0x706   :  { %v1088_v40 = vmul.f32 1.442695, %v1086_v38  ;;  %v517_v41 = vpop.xlane.xlu1 %516  ;;  %v1783_v37 = vpack.c.bf16 %v1313_v36, %v1312_v35 }
 0x707   :  { %1812 = vpow2.f32 %v1090_v39  ;;  %v515_v42 = vpop.xlane.xlu0 %514 }
 0x708   :  { %1814 = vpow2.f32 %v1088_v40 }
 0x709   :  { %1816 = vrcp.f32 %v517_v41 }
 0x70a   :  { %1818 = vrcp.f32 %v515_v42  ;;  %v806_v0 = vpop.xlane.xlu1 %805 }
 0x70b   :  { %v804_v5 = vpop.xlane.xlu0 %803 }
 0x70c   :  { %1820 = vrcp.f32 %v804_v5 }
 0x70d   :  { %1822 = vrcp.f32 %v806_v0 }
 0x711   :  { %v2131_v43 = vpop.eup %1812 }
 0x712   :  { %v2133_v7 = vpop.eup %1814  ;;  %1094 = vadd.xlane.f32.xlu1 %v2131_v43 }
 0x713   :  { %v1817_v44 = vpop.eup %1816  ;;  %1092 = vadd.xlane.f32.xlu0 %v2133_v7 }
 0x714   :  { %v1819_v47 = vpop.eup %1818  ;;  %v521_v50 = vmul.f32 %v1817_v44, %v1805_v17  ;;  %v1300_v17 = vld [vmem:[%s2249_s2 + $0x190] sm:$0xff] }
 0x715   :  { %v520_v48 = vmul.f32 %v1819_v47, %v1807_v18  ;;  %v1301_v18 = vld [vmem:[%s2249_s2 + $0x198] sm:$0xff] }
 0x716   :  { %v1821_v49 = vpop.eup %1820  ;;  %v1759_v21 = vpack.c.bf16 %v1301_v18, %v1300_v17 }
 0x717   :  { %1522 = vmatprep.mubr.f32.mxu1 %v520_v48  ;;  %v809_v52 = vmul.f32 %v1821_v49, %v1811_v20  ;;  %v1823_v15 = vpop.eup %1822 }
 0x718   :  { %1523 = vmatmul.mubr.f32.vlgmr.msra.gmra.mrb[0].mxu1 %v521_v50  ;;  %v810_v20 = vmul.f32 %v1823_v15, %v2098_v19  ;;  %v1305_v19 = vld [vmem:[%s2249_s2 + $0x1b8] sm:$0xff] }
 0x719   :  { %1718 = vmatpush3.bf16.msra.mxu1 %v1715_v34  ;;  %1573 = vmatprep.mubr.f32.mxu1 %v809_v52  ;;  %v1767_v25 = vpack.c.bf16 %v1305_v19, %v1304_v24  ;;  %v1779_v34 = vpack.c.bf16 %v1311_v33, %v1310_v32 }
 0x71a   :  { %1720 = vmatprep.subr.bf16.mxu1 %v1719_v51 }
 0x71d   :  { %1722 = vmatpush3.bf16.msra.mxu1 %v1719_v51 }
 0x71e   :  { %1724 = vmatprep.subr.bf16.mxu1 %v1723_v55 }
 0x721   :  { %1726 = vmatpush3.bf16.msra.mxu1 %v1723_v55 }
 0x722   :  { %1728 = vmatprep.subr.bf16.mxu1 %v1727_v58 }
 0x725   :  { %1730 = vmatpush3.bf16.msra.mxu1 %v1727_v58 }
 0x726   :  { %1732 = vmatprep.subr.bf16.mxu1 %v1731_v61 }
 0x729   :  { %1734 = vmatpush3.bf16.msra.mxu1 %v1731_v61 }
 0x72a   :  { %1736 = vmatprep.subr.bf16.mxu1 %v1735_v1 }
 0x72d   :  { %1738 = vmatpush3.bf16.msra.mxu1 %v1735_v1 }
 0x72e   :  { %1740 = vmatprep.subr.bf16.mxu1 %v1739_v4 }
 0x731   :  { %1742 = vmatpush3.bf16.msra.mxu1 %v1739_v4 }
 0x732   :  { %1744 = vmatprep.subr.bf16.mxu1 %v1743_v11 }
 0x735   :  { %1746 = vmatpush3.bf16.msra.mxu1 %v1743_v11 }
 0x736   :  { %1756 = vmatprep.subr.bf16.mxu1 %v1755_v14 }
 0x738   :  { %1574 = vmatmul.mubr.f32.vlgmr.msra.gmra.mrb[0].mxu1 %v810_v20 }
 0x739   :  { %1758 = vmatpush3.bf16.msra.mxu1 %v1755_v14 }
 0x73a   :  { %1760 = vmatprep.subr.bf16.mxu1 %v1759_v21 }
 0x73d   :  { %1762 = vmatpush3.bf16.msra.mxu1 %v1759_v21 }
 0x73e   :  { %1764 = vmatprep.subr.bf16.mxu1 %v1763_v23 }
 0x741   :  { %1766 = vmatpush3.bf16.msra.mxu1 %v1763_v23 }
 0x742   :  { %1768 = vmatprep.subr.bf16.mxu1 %v1767_v25 }
 0x745   :  { %1770 = vmatpush3.bf16.msra.mxu1 %v1767_v25 }
 0x746   :  { %1772 = vmatprep.subr.bf16.mxu1 %v1771_v28 }
 0x749   :  { %1774 = vmatpush3.bf16.msra.mxu1 %v1771_v28 }
 0x74a   :  { %1776 = vmatprep.subr.bf16.mxu1 %v1775_v31 }
 0x74d   :  { %1778 = vmatpush3.bf16.msra.mxu1 %v1775_v31 }
 0x74e   :  { %1780 = vmatprep.subr.bf16.mxu1 %v1779_v34 }
 0x751   :  { %1782 = vmatpush3.bf16.msra.mxu1 %v1779_v34 }
 0x752   :  { %1784 = vmatprep.subr.bf16.mxu1 %v1783_v37 }
 0x755   :  { %1786 = vmatpush3.bf16.msra.mxu1 %v1783_v37 }
 0x79f   :  { %v1095_v38 = vpop.xlane.xlu1 %1094 }
 0x7a0   :  { %1824 = vrcp.f32 %v1095_v38  ;;  %v1093_v39 = vpop.xlane.xlu0 %1092 }
 0x7a1   :  { %1826 = vrcp.f32 %v1093_v39 }
 0x7aa   :  { %v1825_v40 = vpop.eup %1824 }
 0x7ab   :  { %v1827_v41 = vpop.eup %1826  ;;  %v1099_v5 = vmul.f32 %v1825_v40, %v2131_v43 }
 0x7ac   :  { %v1098_v42 = vmul.f32 %v1827_v41, %v2133_v7 }
 0x7ae   :  { %1624 = vmatprep.mubr.f32.mxu1 %v1098_v42 }
 0x7af   :  { %1625 = vmatmul.mubr.f32.vlgmr.msra.gmra.mrb[0].mxu1 %v1099_v5 }
 0x882   :  { %v1626_v44 = vpop.f32.mrb[0].mxu1 }
 0x883   :  { %v1787_v46 = vadd.f32 %v1626_v44, %v2009_v6  ;;  %v1185_v47 = vpop.f32.mrb[1].mxu1 }
 0x884   :  { %v1788_v48 = vadd.f32 %v1185_v47, %v2011_v8 }
 0x885   :  { %v1208_v49 = vadd.f32 %v1787_v46, %v1314_v45 }
 0x886   :  { %v1207_v50 = vadd.f32 %v1788_v48, %v1314_v45 }
 0x887   :  { %1210 = vst [vmem:[#allocation3 + $0x8] sm:$0xff] %v1208_v49 }
 0x888   :  { %1209 = vst [vmem:[#allocation3] sm:$0xff] %v1207_v50 }
 0x889   :  { %1839 = shalt.err (!%p1836_p4)
}
 0x88a   :  { %s1840_s24 = scalar_lea.hbm %s2254_s7, 256 }
 0x88b   :  { %p1841_p5 = scmp.ne.s32.totalorder %s2254_s7, %s1840_s24  ;;  %p1844_p6 = scmp.lt.u32.totalorder %s1840_s24, %s2254_s7 }
 0x88d   :  { %p1846_p7 = pnand %p1844_p6, %p1841_p5 }
 0x88f   :  { %1849 = shalt.err (!%p1846_p7)
}
 0x890   :  { %s1853_s29 = smov 128   ;;  %s1854_s30 = smov 8  }
 0x891   :  { %1222 = dma.vmem_to_hbm [thread:$0]  %s1217_s22, 256, %s2254_s7, [#allocation4], %s1853_s29, %s1853_s29, %s1854_s30  }
 0x892   :  { %1850 = dma.done.wait [#allocation4], 256  }
 0x893   :  { %1851 = vsyncadd [#allocation4], 4294967040 }
 0x894   :  { %1226 = vsyncpa [#allocation4], 1 }

</bundles_post_ra>
